<compile_context>
chip_gen: v5e
topology: v5e:2x2
jax: 0.10.0
libtpu: 0.0.40
codegen_flags: <defaults>
</compile_context>

<pallas_src>
import math

import jax
import jax.numpy as jnp
from jax.experimental import pallas as pl
from jax.experimental.pallas import tpu as pltpu


def _round_up(x, m):
    return (x + m - 1) // m * m


def _cdiv(a, b):
    return (a + b - 1) // b


# ------------------------------ fused MLP kernel ------------------------------

def _mlp_kernel(x_ref, w1_ref, b1_ref, w2_ref, b2_ref, w3_ref, b3_ref, o_ref):
    # Layer 1: (bm, Ep) @ (Ep, Hp) on MXU (bf16 in, f32 acc), f32 bias + ReLU.
    x = x_ref[...].astype(jnp.bfloat16)
    h1 = jnp.dot(x, w1_ref[...], preferred_element_type=jnp.float32)
    h1 = jnp.maximum(h1 + b1_ref[...], 0.0)
    # Layer 2: (bm, Hp) @ (Hp, Hp).
    h2 = jnp.dot(h1.astype(jnp.bfloat16), w2_ref[...],
                 preferred_element_type=jnp.float32)
    h2 = jnp.maximum(h2 + b2_ref[...], 0.0)
    # Layer 3: output width 1 -> VPU multiply + lane reduction (XLU) against a
    # (1, Hp) weight row instead of a 99%-padded MXU matmul.  b3 is an SMEM scalar.
    s = jnp.sum(h2 * w3_ref[...], axis=-1, keepdims=True) + b3_ref[0]   # (bm, 1) f32
    o_ref[...] = s


# -------------------------- hoisted param preparation --------------------------

def prepare_mlp_params(params):
    """Pad / cast params ONCE (off the per-forward hot path)."""
    w1, b1, w2, b2, w3, b3 = params
    E, H = w1.shape
    assert w2.shape == (H, H) and w3.shape == (H, 1) and b3.shape == (1,)
    Ep, Hp = _round_up(E, 128), _round_up(H, 128)
    f32, bf16 = jnp.float32, jnp.bfloat16
    # Zero padding is exact: padded rows/cols are zero and ReLU(0)=0.
    w1p = jnp.zeros((Ep, Hp), bf16).at[:E, :H].set(w1.astype(bf16))
    b1p = jnp.zeros((1, Hp), f32).at[0, :H].set(b1.astype(f32))
    w2p = jnp.zeros((Hp, Hp), bf16).at[:H, :H].set(w2.astype(bf16))
    b2p = jnp.zeros((1, Hp), f32).at[0, :H].set(b2.astype(f32))
    w3p = jnp.zeros((1, Hp), f32).at[0, :H].set(w3[:, 0].astype(f32))
    b3p = jnp.asarray(b3, f32).reshape((1,))
    return {
        "padded": (w1p, b1p, w2p, b2p, w3p, b3p),
        "orig": tuple(params),
        "E": E, "H": H, "Ep": Ep, "Hp": Hp,
    }


# --------------------------------- forward pass ---------------------------------

def mlp_forward(x, prepared, *, block_m=512, min_pallas_rows=64):
    """x: [N, E] -> [N, 1]  (Linear -> ReLU -> Linear -> ReLU -> Linear)."""
    N, E = x.shape
    assert E == prepared["E"], (E, prepared["E"])

    # Small-N fast path: a single tiny grid step cannot hide launch overhead and
    # the resident-weight DMA; fused XLA wins there.
    if N < min_pallas_rows:
        return mlp_reference(x.astype(jnp.float32), prepared["orig"])

    w1p, b1p, w2p, b2p, w3p, b3p = prepared["padded"]
    Ep, Hp = prepared["Ep"], prepared["Hp"]

    # Row blocking: multiple of 8 sublanes; force >=2 "parallel" blocks when rows
    # permit so both v7x TensorCores are used.
    Np0 = _round_up(max(N, 8), 8)
    bm = _round_up(min(block_m, Np0), 8)
    if Np0 > 8 and Np0 <= bm:
        bm = _round_up(_cdiv(Np0, 2), 8)
    Np = _round_up(Np0, bm)
    num_blocks = Np // bm

    # Only copy/pad x when its shape is not already tile-aligned.
    x = x.astype(jnp.float32)
    if Np != N or Ep != E:
        xp = jnp.zeros((Np, Ep), jnp.float32).at[:N, :E].set(x)
    else:
        xp = x

    out_p = pl.pallas_call(
        _mlp_kernel,
        out_shape=jax.ShapeDtypeStruct((Np, 1), jnp.float32),
        grid=(num_blocks,),
        in_specs=[
            pl.BlockSpec((bm, Ep), lambda i: (i, 0)),            # x row block (f32)
            pl.BlockSpec((Ep, Hp), lambda i: (0, 0)),            # W1 resident (bf16)
            pl.BlockSpec((1, Hp), lambda i: (0, 0)),             # b1 (f32)
            pl.BlockSpec((Hp, Hp), lambda i: (0, 0)),            # W2 resident (bf16)
            pl.BlockSpec((1, Hp), lambda i: (0, 0)),             # b2 (f32)
            pl.BlockSpec((1, Hp), lambda i: (0, 0)),             # W3 row (f32, VPU path)
            pl.BlockSpec(memory_space=pltpu.MemorySpace.SMEM),   # b3 scalar
        ],
        out_specs=pl.BlockSpec((bm, 1), lambda i: (i, 0)),
        compiler_params=pltpu.CompilerParams(
            dimension_semantics=("parallel",)),
    )(xp, w1p, b1p, w2p, b2p, w3p, b3p)

    return out_p[:N]


# ------------------------------ params / reference ------------------------------

def init_mlp_params(key, embeds_dim, hidden_dim=150):
    """PyTorch nn.Linear-style init: U(-1/sqrt(fan_in), 1/sqrt(fan_in)).
    Weights stored as (in, out) for right-multiplication."""
    dims = [(embeds_dim, hidden_dim), (hidden_dim, hidden_dim), (hidden_dim, 1)]
    params = []
    for din, dout in dims:
        key, kw, kb = jax.random.split(key, 3)
        bound = 1.0 / math.sqrt(din)
        w = jax.random.uniform(kw, (din, dout), jnp.float32, -bound, bound)
        b = jax.random.uniform(kb, (dout,), jnp.float32, -bound, bound)
        params += [w, b]
    return tuple(params)


def mlp_reference(x, params):
    w1, b1, w2, b2, w3, b3 = params
    h = jnp.maximum(x @ w1 + b1, 0.0)
    h = jnp.maximum(h @ w2 + b2, 0.0)
    return h @ w3 + b3


def mlp_reference_bf16(x, params):
    """Same matmul dtypes as the kernel (bf16 MXU operands, f32 accumulation)."""
    w1, b1, w2, b2, w3, b3 = params
    bf16 = jnp.bfloat16
    h = jnp.dot(x.astype(bf16), w1.astype(bf16), preferred_element_type=jnp.float32)
    h = jnp.maximum(h + b1, 0.0)
    h = jnp.dot(h.astype(bf16), w2.astype(bf16), preferred_element_type=jnp.float32)
    h = jnp.maximum(h + b2, 0.0)
    return h @ w3 + b3


# -------------------------------------- main --------------------------------------

if __name__ == "__main__":
    key = jax.random.PRNGKey(0)

    embeds_dim = 256      # mention-pair representation size (example)
    hidden_dim = 150      # constructor default of mlp
    n_rows = 512          # number of candidate pairs scored in one call

    key, k_x, k_p = jax.random.split(key, 3)
    x = jax.random.normal(k_x, (n_rows, embeds_dim), dtype=jnp.float32)
    params = init_mlp_params(k_p, embeds_dim, hidden_dim)
    prepared = prepare_mlp_params(params)     # padding/casting hoisted, done once

    scores = mlp_forward(x, prepared)
    scores = jax.block_until_ready(scores)

    assert scores.shape == (n_rows, 1), scores.shape
    assert bool(jnp.all(jnp.isfinite(scores)))

    # Tight check against a reference using the same matmul dtypes as the kernel.
    ref_bf16 = mlp_reference_bf16(x, params)
    assert bool(jnp.allclose(scores, ref_bf16, rtol=1e-2, atol=1e-2)), (
        float(jnp.max(jnp.abs(scores - ref_bf16))))
    # Loose sanity check against the original f32-module semantics.
    ref_f32 = mlp_reference(x, params)
    assert bool(jnp.allclose(scores, ref_f32, rtol=1e-1, atol=1e-1)), (
        float(jnp.max(jnp.abs(scores - ref_f32))))

    print("KERNEL_OK")
</pallas_src>

<mosaic_0001>
module attributes {stable_mosaic.version = 11 : i64} {
  func.func @_mlp_kernel(%arg0: i32, %arg1: memref<256x256xf32, #tpu.memory_space<vmem>>, %arg2: memref<256x256xbf16, #tpu.memory_space<vmem>>, %arg3: memref<1x256xf32, #tpu.memory_space<vmem>>, %arg4: memref<256x256xbf16, #tpu.memory_space<vmem>>, %arg5: memref<1x256xf32, #tpu.memory_space<vmem>>, %arg6: memref<1x256xf32, #tpu.memory_space<vmem>>, %arg7: memref<1xf32, #tpu.memory_space<smem>>, %arg8: memref<256x1xf32, #tpu.memory_space<vmem>>) attributes {dimension_semantics = [#tpu.dimension_semantics<parallel>], iteration_bounds = array<i64: 2>, scalar_prefetch = 0 : i64, scratch_operands = 0 : i64, tpu.core_type = #tpu.core_type<tc>, window_params = [{transform_indices = @transform_0, window_bounds = array<i64: 256, 256>}, {pipeline_mode = #tpu.pipeline_mode<synchronous>, transform_indices = @transform_1, window_bounds = array<i64: 256, 256>}, {pipeline_mode = #tpu.pipeline_mode<synchronous>, transform_indices = @transform_2, window_bounds = array<i64: 1, 256>}, {pipeline_mode = #tpu.pipeline_mode<synchronous>, transform_indices = @transform_3, window_bounds = array<i64: 256, 256>}, {pipeline_mode = #tpu.pipeline_mode<synchronous>, transform_indices = @transform_4, window_bounds = array<i64: 1, 256>}, {pipeline_mode = #tpu.pipeline_mode<synchronous>, transform_indices = @transform_5, window_bounds = array<i64: 1, 256>}, {transform_indices = @transform_6, window_bounds = array<i64: 1>}, {transform_indices = @transform_7, window_bounds = array<i64: 256, 1>}]} {
    %c0 = arith.constant 0 : index
    %c0_0 = arith.constant 0 : index
    %0 = vector.load %arg1[%c0, %c0_0] : memref<256x256xf32, #tpu.memory_space<vmem>>, vector<256x256xf32>
    %1 = arith.truncf %0 : vector<256x256xf32> to vector<256x256xbf16>
    %c0_1 = arith.constant 0 : index
    %c0_2 = arith.constant 0 : index
    %2 = vector.load %arg2[%c0_1, %c0_2] : memref<256x256xbf16, #tpu.memory_space<vmem>>, vector<256x256xbf16>
    %cst = arith.constant dense<0.000000e+00> : vector<256x256xf32>
    %3 = tpu.matmul %1, %2, %cst {dimension_numbers = #tpu.dot_dimension_numbers<[1], [0], [0], [1], [0, 0, 1, 1], [], []>} : vector<256x256xbf16>, vector<256x256xbf16>, vector<256x256xf32> -> vector<256x256xf32>
    %c0_3 = arith.constant 0 : index
    %c0_4 = arith.constant 0 : index
    %4 = vector.load %arg3[%c0_3, %c0_4] : memref<1x256xf32, #tpu.memory_space<vmem>>, vector<1x256xf32>
    %5 = vector.broadcast %4 : vector<1x256xf32> to vector<256x256xf32>
    %6 = arith.addf %3, %5 : vector<256x256xf32>
    %cst_5 = arith.constant 0.000000e+00 : f32
    %7 = vector.broadcast %cst_5 : f32 to vector<256x256xf32>
    %8 = arith.maximumf %6, %7 : vector<256x256xf32>
    %9 = arith.truncf %8 : vector<256x256xf32> to vector<256x256xbf16>
    %c0_6 = arith.constant 0 : index
    %c0_7 = arith.constant 0 : index
    %10 = vector.load %arg4[%c0_6, %c0_7] : memref<256x256xbf16, #tpu.memory_space<vmem>>, vector<256x256xbf16>
    %cst_8 = arith.constant dense<0.000000e+00> : vector<256x256xf32>
    %11 = tpu.matmul %9, %10, %cst_8 {dimension_numbers = #tpu.dot_dimension_numbers<[1], [0], [0], [1], [0, 0, 1, 1], [], []>} : vector<256x256xbf16>, vector<256x256xbf16>, vector<256x256xf32> -> vector<256x256xf32>
    %c0_9 = arith.constant 0 : index
    %c0_10 = arith.constant 0 : index
    %12 = vector.load %arg5[%c0_9, %c0_10] : memref<1x256xf32, #tpu.memory_space<vmem>>, vector<1x256xf32>
    %13 = vector.broadcast %12 : vector<1x256xf32> to vector<256x256xf32>
    %14 = arith.addf %11, %13 : vector<256x256xf32>
    %cst_11 = arith.constant 0.000000e+00 : f32
    %15 = vector.broadcast %cst_11 : f32 to vector<256x256xf32>
    %16 = arith.maximumf %14, %15 : vector<256x256xf32>
    %c0_12 = arith.constant 0 : index
    %c0_13 = arith.constant 0 : index
    %17 = vector.load %arg6[%c0_12, %c0_13] : memref<1x256xf32, #tpu.memory_space<vmem>>, vector<1x256xf32>
    %18 = vector.broadcast %17 : vector<1x256xf32> to vector<256x256xf32>
    %19 = arith.mulf %16, %18 : vector<256x256xf32>
    %cst_14 = arith.constant dense<0.000000e+00> : vector<256xf32>
    %20 = vector.multi_reduction <add>, %19, %cst_14 [1] : vector<256x256xf32> to vector<256xf32>
    %21 = vector.shape_cast %20 : vector<256xf32> to vector<256x1xf32>
    %c0_15 = arith.constant 0 : index
    %22 = memref.load %arg7[%c0_15] : memref<1xf32, #tpu.memory_space<smem>>
    %23 = vector.broadcast %22 : f32 to vector<256x1xf32>
    %24 = arith.addf %21, %23 : vector<256x1xf32>
    %c0_16 = arith.constant 0 : index
    %c0_17 = arith.constant 0 : index
    %25 = vector.load %arg8[%c0_16, %c0_17] : memref<256x1xf32, #tpu.memory_space<vmem>>, vector<256x1xf32>
    tpu.vector_store %arg8[%c0_16, %c0_17], %24 {strides = array<i32>} : memref<256x1xf32, #tpu.memory_space<vmem>>, vector<256x1xf32>,
    return
  }
  func.func @transform_0(%arg0: i32) -> (i32, i32) {
    %c0_i32 = arith.constant 0 : i32
    %c0_i32_0 = arith.constant 0 : i32
    return %arg0, %c0_i32 : i32, i32
  }
  func.func @transform_1(%arg0: i32) -> (i32, i32) {
    %c0_i32 = arith.constant 0 : i32
    %c0_i32_0 = arith.constant 0 : i32
    %c0_i32_1 = arith.constant 0 : i32
    return %c0_i32, %c0_i32_0 : i32, i32
  }
  func.func @transform_2(%arg0: i32) -> (i32, i32) {
    %c0_i32 = arith.constant 0 : i32
    %c0_i32_0 = arith.constant 0 : i32
    %c0_i32_1 = arith.constant 0 : i32
    return %c0_i32, %c0_i32_0 : i32, i32
  }
  func.func @transform_3(%arg0: i32) -> (i32, i32) {
    %c0_i32 = arith.constant 0 : i32
    %c0_i32_0 = arith.constant 0 : i32
    %c0_i32_1 = arith.constant 0 : i32
    return %c0_i32, %c0_i32_0 : i32, i32
  }
  func.func @transform_4(%arg0: i32) -> (i32, i32) {
    %c0_i32 = arith.constant 0 : i32
    %c0_i32_0 = arith.constant 0 : i32
    %c0_i32_1 = arith.constant 0 : i32
    return %c0_i32, %c0_i32_0 : i32, i32
  }
  func.func @transform_5(%arg0: i32) -> (i32, i32) {
    %c0_i32 = arith.constant 0 : i32
    %c0_i32_0 = arith.constant 0 : i32
    %c0_i32_1 = arith.constant 0 : i32
    return %c0_i32, %c0_i32_0 : i32, i32
  }
  func.func @transform_6(%arg0: i32) -> i32 {
    %c0_i32 = arith.constant 0 : i32
    %c0_i32_0 = arith.constant 0 : i32
    return %c0_i32 : i32
  }
  func.func @transform_7(%arg0: i32) -> (i32, i32) {
    %c0_i32 = arith.constant 0 : i32
    %c0_i32_0 = arith.constant 0 : i32
    return %arg0, %c0_i32 : i32, i32
  }
}

</mosaic_0001>

<bundles_post_ra>
// kernel: tpu_custom_call.1
= control target key start
LH: loop header
LB: loop body
LE: loop exit
PB: predicated region body
PF: predicated region fallthrough
CT: control target
= control target key end

     0   :  { %s3220_s0 = inlined_call_operand.hbm [shape: f32[512,256], index: 0, kind: input, shape index: {}]   ;;  %s3221_s1 = inlined_call_operand.hbm [shape: bf16[256,256], index: 1, kind: input, shape index: {}]   ;;  %s3222_s2 = inlined_call_operand.vmem [shape: f32[1,256], index: 2, kind: input, shape index: {}]   ;;  %s3223_s3 = inlined_call_operand.hbm [shape: bf16[256,256], index: 3, kind: input, shape index: {}]   ;;  %s3224_s4 = inlined_call_operand.vmem [shape: f32[1,256], index: 4, kind: input, shape index: {}]   ;;  %s3225_s5 = inlined_call_operand.vmem [shape: f32[1,256], index: 5, kind: input, shape index: {}]   ;;  %s3226_s6 = inlined_call_operand.<no memory space> [shape: f32[1], index: 6, kind: input, shape index: {}]   ;;  %s3227_s7 = inlined_call_operand.vmem [shape: f32[512,1], index: 7, kind: output, shape index: {}]  }
   0x1   :  { %12 = sst [smem:[#allocation2]] %s3226_s6 }
   0x2   :  { %13 = vsyncpa [#allocation4], 0 }
   0x3   :  { %15 = vsyncpa [#allocation4 + $0x1], 0 }
   0x4   :  { %16 = vsyncpa [#allocation6], 0  ;;  %s2604_s26 = smov 0   ;;  %s2606_s27 = smov 0  }
   0x5   :  { %s2608_s28 = smov 0   ;;  %s2610_s29 = smov 0  }
   0x6 LB: > { %s2021_s6 = sadd.s32 4294967295, %s2553_s29   ;;  %p42_p0 = scmp.ne.s32.totalorder %s2545_s27, %s2541_s26  ;;  %s2553_s29 = sphi %s2610_s29, %s3236_s29   ;;  %s2549_s28 = sphi %s2608_s28, %s3235_s28   ;;  %s2545_s27 = sphi %s2606_s27, %s3234_s27   ;;  %s2541_s26 = sphi %s2604_s26, %s3233_s26  }
   0x7   : > { %p2626_p1 = scmp.eq.s32.totalorder %s2021_s6, 0  ;;  %p2023_p2 = scmp.ge.s32.totalorder %s2553_s29, 1 }
   0x8   : > { %p205_p3 = scmp.lt.s32.totalorder %s2553_s29, 3  ;;  %s216_s11 = sshll.u32 %s3221_s1, 4  ;;  %s217_s11 = int_to_ptr.hbm [resolvable:$true] %s216_s11 }
   0x9   : > { %p2634_p4 = por %p2626_p1, %p42_p0  ;;  %s2555_s13 = smov [#allocation5]  }
   0xa   : > { %p2641_p5 = pnand %p2023_p2, %p205_p3  ;;  %s218_s14 = sshll.u32 %s2555_s13, 4  ;;  %s219_s14 = int_to_ptr.vmem [resolvable:$true] %s218_s14 }
   0xb   : > { %s233_s17 = sshll.u32 %s3223_s3, 4  ;;  %s2556_s18 = smov 128   ;;  %s234_s17 = int_to_ptr.hbm [resolvable:$true] %s233_s17 }
   0xc   : > { %p2371_p6 = pneg %p2641_p5  ;;  %s2557_s19 = smov 8  }
   0xd   : > { %s2558_s20 = smov [#allocation7]   ;;  %s2653_s22 = sadd.s32 1, %s2553_s29  }
   0xe   : > { %p2372_p7 = pnand %p2371_p6, %p2626_p1  ;;  %s235_s21 = sshll.u32 %s2558_s20, 4  ;;  %s236_s21 = int_to_ptr.vmem [resolvable:$true] %s235_s21 }
   0xf   : > { %s29_s23 = sadd.s32 1, %s2549_s28  ;;  %s26_s24 = ssub.s32 %s2553_s29, %s2653_s22 }
  0x10   : > { %2374 = dma.hbm_to_vmem [thread:$0]  (!%p2372_p7), %s217_s11, 4096, %s219_s14, [#allocation6], %s2556_s18, %s2556_s18, %s2557_s19  }
  0x11   : > { %2377 = dma.hbm_to_vmem [thread:$0]  (!%p2372_p7), %s234_s17, 4096, %s236_s21, [#allocation6], %s2556_s18, %s2556_s18, %s2557_s19  }
  0x12   : > { %p36_p8 = scmp.ne.s32.totalorder %s2549_s28, %s2545_s27  ;;  %p27_p9 = scmp.eq.s32.totalorder %s26_s24, 0 }
  0x13   : > { %p37_p10 = scmp.eq.s32.totalorder %s2553_s29, 0  ;;  %p2384_p11 = scmp.lt.s32.totalorder %s2553_s29, 2 }
  0x14   : > { %s258_s25 = sand.u32 1, %s2549_s28   ;;  %s2296_s10 = sshll.u32 %s2553_s29, 9 }
  0x15   : > { %s2664_s26 = scalar_select %p27_p9, %s2549_s28, %s29_s23  }
  0x16   : > { %p38_p12 = por %p37_p10, %p36_p8  ;;  %s2027_s9 = sshll.u32 %s258_s25, 9 }
  0x17   : > { %s268_s14 = scalar_lea.hbm %s3220_s0, %s2296_s10  ;;  %s262_s16 = scalar_lea.vmem [#allocation3], %s2027_s9 }
  0x18   : > { %s269_s15 = sshll.u32 %s268_s14, 4  ;;  %s271_s17 = sshll.u32 %s262_s16, 4  ;;  %s270_s15 = int_to_ptr.hbm [resolvable:$true] %s269_s15  ;;  %s272_s17 = int_to_ptr.vmem [resolvable:$true] %s271_s17 }
  0x19   : > { %p2670_p13 = pnand %p2384_p11, %p38_p12  ;;  %s259_s19 = scalar_lea.sflag [#allocation4], %s258_s25 }
  0x1a   : > { %s2485_s20 = sshra.s32 %s270_s15, 4  ;;  %s2492_s9 = scalar_lea.hbm %s3220_s0, 1024  ;;  %s2486_s20 = int_to_ptr.hbm [resolvable:$true] %s2485_s20 }
  0x1b   : > { %s2487_s21 = scalar_lea.hbm %s2486_s20, 512  ;;  %p2489_p2 = pneg %p2670_p13 }
  0x1c   : > { %p2488_p0 = scmp.ne.s32.totalorder %s2486_s20, %s2487_s21  ;;  %p2493_p7 = scmp.lt.s32.totalorder %s2486_s20, %s3220_s0 }
  0x1d   : > { %p2494_p8 = scmp.lt.s32.totalorder %s2492_s9, %s2487_s21 }
  0x1e   : > { %p2490_p3 = pnand %p2489_p2, %p2488_p0 }
  0x1f   : > { %p2495_p9 = por %p2494_p8, %p2493_p7 }
  0x20   : > { %p2491_p6 = pneg %p2490_p3 }
  0x22   : > { %p2496_p10 = pnand %p2495_p9, %p2491_p6 }
  0x24   : > { %2499 = shalt.err (!%p2496_p10)
}
  0x25   : > { %s2559_s25 = smov 256   ;;  %s2560_s13 = smov 16  }
  0x26   : > { %2381 = dma.hbm_to_vmem [thread:$0]  (!%p2670_p13), %s270_s15, 8192, %s272_s17, %s259_s19, %s2559_s25, %s2559_s25, %s2560_s13  }
  0x27   : > { %283 = sbr.rel (%p2641_p5) target bundleno = 848 (0x350), region = 48  ;;  %s285_s14 = sand.u32 (!%p2641_p5), 1, %s2545_s27  }
  0x28   : > { %s2032_s16 = sshll.u32 (!%p2641_p5), %s285_s14, 9  ;;  %s286_s23 = scalar_lea.sflag (!%p2641_p5), [#allocation4], %s285_s14 }
  0x29   : > { %s2687_s24 = scalar_lea.vmem (!%p2641_p5), [#allocation3], %s2032_s16 }
  0x2c   : > { %2532 = dma.done.wait (%p2634_p4), %s286_s23, 8192  }
  0x2d   : > { %2534 = vsyncadd (%p2634_p4), %s286_s23, 4294959104 }
  0x2e   : > { %2536 = dma.done.wait (%p2626_p1), [#allocation6], 8192  }
  0x2f   : > { %2538 = vsyncadd (%p2626_p1), [#allocation6], 4294959104  ;;  %v2095_v0 = vld [vmem:[#allocation5 + $0x70] sm:$0xf]  ;;  %v2312_v1 = vld [vmem:[#allocation5 + $0x74] sm:$0xf0] }
  0x30   : > { %v2159_v2 = vld [vmem:[#allocation5 + $0xf0] sm:$0xf]  ;;  %v2096_v3 = vor.u32 %v2312_v1, %v2095_v0  ;;  %v2328_v4 = vld [vmem:[#allocation5 + $0xf4] sm:$0xf0]  ;;  %v2311_v5 = vld [vmem:[#allocation5 + $0x74] sm:$0xf] }
  0x31   : > { %v2097_v6 = vld [vmem:[#allocation5 + $0x78] sm:$0xf0]  ;;  %v2160_v7 = vor.u32 %v2328_v4, %v2159_v2  ;;  %v2327_v9 = vld [vmem:[#allocation5 + $0xf4] sm:$0xf]  ;;  %v2087_v11 = vld [vmem:[#allocation5 + $0x60] sm:$0xf] }
  0x32   : > { %v2100_v8 = vor.u32 %v2311_v5, %v2097_v6  ;;  %v2161_v10 = vld [vmem:[#allocation5 + $0xf8] sm:$0xf0]  ;;  %632 = vmatpush.bf16.msra.mxu0 %v2096_v3  ;;  %v2310_v13 = vld [vmem:[#allocation5 + $0x64] sm:$0xf0]  ;;  %v2151_v14 = vld [vmem:[#allocation5 + $0xe0] sm:$0xf] }
  0x33   : > { %v2164_v12 = vor.u32 %v2327_v9, %v2161_v10  ;;  %v2326_v15 = vld [vmem:[#allocation5 + $0xe4] sm:$0xf0]  ;;  %721 = vmatpush.bf16.msra.mxu1 %v2160_v7  ;;  %v2088_v16 = vor.u32 %v2310_v13, %v2087_v11  ;;  %v2309_v18 = vld [vmem:[#allocation5 + $0x64] sm:$0xf]  ;;  %v2089_v19 = vld [vmem:[#allocation5 + $0x68] sm:$0xf0] }
  0x34   : > { %810 = vmatpush.bf16.msra.mxu2 %v2100_v8  ;;  %v2152_v17 = vor.u32 %v2326_v15, %v2151_v14  ;;  %v2325_v20 = vld [vmem:[#allocation5 + $0xe4] sm:$0xf]  ;;  %v2092_v21 = vor.u32 %v2309_v18, %v2089_v19  ;;  %v2153_v22 = vld [vmem:[#allocation5 + $0xe8] sm:$0xf0]  ;;  %v2079_v23 = vld [vmem:[#allocation5 + $0x50] sm:$0xf] }
  0x35   : > { %899 = vmatpush.bf16.msra.mxu3 %v2164_v12  ;;  %v2308_v24 = vld [vmem:[#allocation5 + $0x54] sm:$0xf0]  ;;  %v2156_v25 = vor.u32 %v2325_v20, %v2153_v22  ;;  %v2143_v26 = vld [vmem:[#allocation5 + $0xd0] sm:$0xf]  ;;  %v2307_v28 = vld [vmem:[#allocation5 + $0x54] sm:$0xf] }
  0x36   : > { %v2324_v27 = vld [vmem:[#allocation5 + $0xd4] sm:$0xf0]  ;;  %633 = vmatpush.bf16.msra.mxu0 %v2088_v16  ;;  %v2080_v29 = vor.u32 %v2308_v24, %v2079_v23  ;;  %v2081_v30 = vld [vmem:[#allocation5 + $0x58] sm:$0xf0]  ;;  %v2323_v31 = vld [vmem:[#allocation5 + $0xd4] sm:$0xf] }
  0x37   : > { %v2145_v32 = vld [vmem:[#allocation5 + $0xd8] sm:$0xf0]  ;;  %722 = vmatpush.bf16.msra.mxu1 %v2152_v17  ;;  %v2144_v33 = vor.u32 %v2324_v27, %v2143_v26  ;;  %v2084_v34 = vor.u32 %v2307_v28, %v2081_v30  ;;  %v2071_v35 = vld [vmem:[#allocation5 + $0x40] sm:$0xf]  ;;  %v2306_v36 = vld [vmem:[#allocation5 + $0x44] sm:$0xf0] }
  0x38   : > { %811 = vmatpush.bf16.msra.mxu2 %v2092_v21  ;;  %v2135_v37 = vld [vmem:[#allocation5 + $0xc0] sm:$0xf]  ;;  %v2148_v38 = vor.u32 %v2323_v31, %v2145_v32  ;;  %v2322_v39 = vld [vmem:[#allocation5 + $0xc4] sm:$0xf0]  ;;  %v2305_v40 = vld [vmem:[#allocation5 + $0x44] sm:$0xf]  ;;  %v2072_v44 = vor.u32 %v2306_v36, %v2071_v35 }
  0x39   : > { %900 = vmatpush.bf16.msra.mxu3 %v2156_v25  ;;  %v2073_v41 = vld [vmem:[#allocation5 + $0x48] sm:$0xf0]  ;;  %v2321_v42 = vld [vmem:[#allocation5 + $0xc4] sm:$0xf]  ;;  %v2136_v45 = vor.u32 %v2322_v39, %v2135_v37  ;;  %v2063_v47 = vld [vmem:[#allocation5 + $0x30] sm:$0xf] }
  0x3a   : > { %v2137_v43 = vld [vmem:[#allocation5 + $0xc8] sm:$0xf0]  ;;  %634 = vmatpush.bf16.msra.mxu0 %v2080_v29  ;;  %v2076_v46 = vor.u32 %v2305_v40, %v2073_v41  ;;  %v2304_v48 = vld [vmem:[#allocation5 + $0x34] sm:$0xf0]  ;;  %v2127_v49 = vld [vmem:[#allocation5 + $0xb0] sm:$0xf] }
  0x3b   : > { %723 = vmatpush.bf16.msra.mxu1 %v2144_v33  ;;  %v2140_v50 = vor.u32 %v2321_v42, %v2137_v43  ;;  %v2320_v51 = vld [vmem:[#allocation5 + $0xb4] sm:$0xf0]  ;;  %v2303_v52 = vld [vmem:[#allocation5 + $0x34] sm:$0xf]  ;;  %v2065_v53 = vld [vmem:[#allocation5 + $0x38] sm:$0xf0]  ;;  %v2064_v56 = vor.u32 %v2304_v48, %v2063_v47 }
  0x3c   : > { %812 = vmatpush.bf16.msra.mxu2 %v2084_v34  ;;  %v2319_v54 = vld [vmem:[#allocation5 + $0xb4] sm:$0xf]  ;;  %v2129_v55 = vld [vmem:[#allocation5 + $0xb8] sm:$0xf0]  ;;  %v2128_v57 = vor.u32 %v2320_v51, %v2127_v49  ;;  %v2068_v58 = vor.u32 %v2303_v52, %v2065_v53  ;;  %v2055_v59 = vld [vmem:[#allocation5 + $0x20] sm:$0xf] }
  0x3d   : > { %901 = vmatpush.bf16.msra.mxu3 %v2148_v38  ;;  %v2302_v60 = vld [vmem:[#allocation5 + $0x24] sm:$0xf0]  ;;  %v2119_v61 = vld [vmem:[#allocation5 + $0xa0] sm:$0xf]  ;;  %v2132_v62 = vor.u32 %v2319_v54, %v2129_v55  ;;  %v2301_v0 = vld [vmem:[#allocation5 + $0x24] sm:$0xf] }
  0x3e   : > { %635 = vmatpush.bf16.msra.mxu0 %v2072_v44  ;;  %v2318_v63 = vld [vmem:[#allocation5 + $0xa4] sm:$0xf0]  ;;  %v2057_v1 = vld [vmem:[#allocation5 + $0x28] sm:$0xf0]  ;;  %v2317_v2 = vld [vmem:[#allocation5 + $0xa4] sm:$0xf]  ;;  %v2056_v4 = vor.u32 %v2302_v60, %v2055_v59 }
  0x3f   : > { %724 = vmatpush.bf16.msra.mxu1 %v2136_v45  ;;  %v2121_v3 = vld [vmem:[#allocation5 + $0xa8] sm:$0xf0]  ;;  %v2120_v5 = vor.u32 %v2318_v63, %v2119_v61  ;;  %v2060_v6 = vor.u32 %v2301_v0, %v2057_v1  ;;  %v2047_v7 = vld [vmem:[#allocation5 + $0x10] sm:$0xf]  ;;  %v2300_v8 = vld [vmem:[#allocation5 + $0x14] sm:$0xf0] }
  0x40   : > { %813 = vmatpush.bf16.msra.mxu2 %v2076_v46  ;;  %v2111_v9 = vld [vmem:[#allocation5 + $0x90] sm:$0xf]  ;;  %v2124_v10 = vor.u32 %v2317_v2, %v2121_v3  ;;  %v2316_v11 = vld [vmem:[#allocation5 + $0x94] sm:$0xf0]  ;;  %v2299_v12 = vld [vmem:[#allocation5 + $0x14] sm:$0xf]  ;;  %v2048_v16 = vor.u32 %v2300_v8, %v2047_v7 }
  0x41   : > { %902 = vmatpush.bf16.msra.mxu3 %v2140_v50  ;;  %v2049_v13 = vld [vmem:[#allocation5 + $0x18] sm:$0xf0]  ;;  %v2315_v14 = vld [vmem:[#allocation5 + $0x94] sm:$0xf]  ;;  %v2039_v17 = vld [vmem:[#allocation5] sm:$0xf]  ;;  %v2112_v19 = vor.u32 %v2316_v11, %v2111_v9 }
  0x42   : > { %636 = vmatpush.bf16.msra.mxu0 %v2064_v56  ;;  %v2113_v15 = vld [vmem:[#allocation5 + $0x98] sm:$0xf0]  ;;  %v2298_v18 = vld [vmem:[#allocation5 + $0x4] sm:$0xf0]  ;;  %v2052_v20 = vor.u32 %v2299_v12, %v2049_v13  ;;  %v2103_v21 = vld [vmem:[#allocation5 + $0x80] sm:$0xf] }
  0x43   : > { %725 = vmatpush.bf16.msra.mxu1 %v2128_v57  ;;  %v2314_v22 = vld [vmem:[#allocation5 + $0x84] sm:$0xf0]  ;;  %v2297_v23 = vld [vmem:[#allocation5 + $0x4] sm:$0xf]  ;;  %v2116_v24 = vor.u32 %v2315_v14, %v2113_v15  ;;  %v2041_v25 = vld [vmem:[#allocation5 + $0x8] sm:$0xf0]  ;;  %v2040_v31 = vor.u32 %v2298_v18, %v2039_v17 }
  0x44   : > { %814 = vmatpush.bf16.msra.mxu2 %v2068_v58  ;;  %v2313_v26 = vld [vmem:[#allocation5 + $0x84] sm:$0xf]  ;;  %v2105_v27 = vld [vmem:[#allocation5 + $0x88] sm:$0xf0]  ;;  %v2343_v29 = vld [vmem:[#allocation7 + $0x74] sm:$0xf]  ;;  %v2104_v35 = vor.u32 %v2314_v22, %v2103_v21  ;;  %v2044_v36 = vor.u32 %v2297_v23, %v2041_v25 }
  0x45   : > { %903 = vmatpush.bf16.msra.mxu3 %v2132_v62  ;;  %v338_v28 = vld [vmem:[%s2687_s24] sm:$0xff]  ;;  %v2225_v30 = vld [vmem:[#allocation7 + $0x78] sm:$0xf0]  ;;  %v340_v32 = vld [vmem:[%s2687_s24 + $0x10] sm:$0xff]  ;;  %v2108_v39 = vor.u32 %v2313_v26, %v2105_v27  ;;  %s2035_s19 = sshll.u32 %s2021_s6, 5  ;;  %s1868_s20 = sld [smem:[#allocation2]] }
  0x46   : > { %637 = vmatpush.bf16.msra.mxu0 %v2056_v4  ;;  %v2359_v33 = vld [vmem:[#allocation7 + $0xf4] sm:$0xf]  ;;  %v2289_v34 = vld [vmem:[#allocation7 + $0xf8] sm:$0xf0]  ;;  %v339_v37 = vld [vmem:[%s2687_s24 + $0x8] sm:$0xff]  ;;  %v2228_v40 = vor.u32 %v2343_v29, %v2225_v30  ;;  %v402_v43 = vpack.c.bf16 %v340_v32, %v338_v28  ;;  %p333_p1 = scmp.lt.s32.totalorder %s2035_s19, 63 }
  0x47   : > { %726 = vmatpush.bf16.msra.mxu1 %v2120_v5  ;;  %v341_v38 = vld [vmem:[%s2687_s24 + $0x18] sm:$0xff]  ;;  %v2223_v41 = vld [vmem:[#allocation7 + $0x70] sm:$0xf]  ;;  %v2292_v44 = vor.u32 %v2359_v33, %v2289_v34  ;;  %v2341_v50 = vld [vmem:[#allocation7 + $0x64] sm:$0xf]  ;;  %vm1902_vm0 = vcmask 7168  }
  0x48   : > { %815 = vmatpush.bf16.msra.mxu2 %v2060_v6  ;;  %v2344_v42 = vld [vmem:[#allocation7 + $0x74] sm:$0xf0]  ;;  %v2287_v45 = vld [vmem:[#allocation7 + $0xf0] sm:$0xf]  ;;  %v403_v47 = vpack.c.bf16 %v341_v38, %v339_v37  ;;  %v2217_v51 = vld [vmem:[#allocation7 + $0x68] sm:$0xf0] }
  0x49   : > { %904 = vmatpush.bf16.msra.mxu3 %v2124_v10  ;;  %v2360_v46 = vld [vmem:[#allocation7 + $0xf4] sm:$0xf0]  ;;  %v2224_v48 = vor.u32 %v2344_v42, %v2223_v41  ;;  %v2357_v52 = vld [vmem:[#allocation7 + $0xe4] sm:$0xf]  ;;  %v2220_v53 = vor.u32 %v2341_v50, %v2217_v51  ;;  %v2281_v54 = vld [vmem:[#allocation7 + $0xe8] sm:$0xf0] }
  0x4a   : > { %638 = vmatpush.bf16.msra.mxu0 %v2048_v16  ;;  %v2288_v49 = vor.u32 %v2360_v46, %v2287_v45  ;;  %v2215_v55 = vld [vmem:[#allocation7 + $0x60] sm:$0xf]  ;;  %v2342_v56 = vld [vmem:[#allocation7 + $0x64] sm:$0xf0]  ;;  %v2284_v57 = vor.u32 %v2357_v52, %v2281_v54  ;;  %v344_v63 = vld [vmem:[%s2687_s24 + $0x30] sm:$0xff]  ;;  %s3238_s19 = smov (!%p333_p1, %s2035_s19), 63 }
  0x4b   : > { %727 = vmatpush.bf16.msra.mxu1 %v2112_v19  ;;  %v2216_v58 = vor.u32 %v2342_v56, %v2215_v55  ;;  %v2279_v59 = vld [vmem:[#allocation7 + $0xe0] sm:$0xf]  ;;  %v2358_v60 = vld [vmem:[#allocation7 + $0xe4] sm:$0xf0]  ;;  %v345_v1 = vld [vmem:[%s2687_s24 + $0x38] sm:$0xff]  ;;  %s2036_s29 = sshll.u32 %s3238_s19, 3 }
  0x4c   : > { %816 = vmatpush.bf16.msra.mxu2 %v2052_v20  ;;  %v2280_v61 = vor.u32 %v2358_v60, %v2279_v59  ;;  %v342_v62 = vld [vmem:[%s2687_s24 + $0x20] sm:$0xff]  ;;  %v343_v0 = vld [vmem:[%s2687_s24 + $0x28] sm:$0xff]  ;;  %v348_v5 = vld [vmem:[%s2687_s24 + $0x50] sm:$0xff]  ;;  %s3044_s9 = scalar_lea.vmem %s3227_s7, %s2036_s29 }
  0x4d   : > { %905 = vmatpush.bf16.msra.mxu3 %v2116_v24  ;;  %v404_v2 = vpack.c.bf16 %v344_v63, %v342_v62  ;;  %v405_v3 = vpack.c.bf16 %v345_v1, %v343_v0  ;;  %v346_v4 = vld [vmem:[%s2687_s24 + $0x40] sm:$0xff]  ;;  %v347_v6 = vld [vmem:[%s2687_s24 + $0x48] sm:$0xff]  ;;  %v349_v7 = vld [vmem:[%s2687_s24 + $0x58] sm:$0xff] }
  0x4e   : > { %639 = vmatpush.bf16.msra.mxu0 %v2040_v31  ;;  %v406_v8 = vpack.c.bf16 %v348_v5, %v346_v4  ;;  %v407_v9 = vpack.c.bf16 %v349_v7, %v347_v6  ;;  %v2339_v10 = vld [vmem:[#allocation7 + $0x54] sm:$0xf]  ;;  %v2209_v11 = vld [vmem:[#allocation7 + $0x58] sm:$0xf0]  ;;  %v2207_v15 = vld [vmem:[#allocation7 + $0x50] sm:$0xf] }
  0x4f   : > { %728 = vmatpush.bf16.msra.mxu1 %v2104_v35  ;;  %v2355_v12 = vld [vmem:[#allocation7 + $0xd4] sm:$0xf]  ;;  %v2212_v13 = vor.u32 %v2339_v10, %v2209_v11  ;;  %v2273_v14 = vld [vmem:[#allocation7 + $0xd8] sm:$0xf0]  ;;  %v2340_v16 = vld [vmem:[#allocation7 + $0x54] sm:$0xf0] }
  0x50   : > { %817 = vmatpush.bf16.msra.mxu2 %v2044_v36  ;;  %v2276_v17 = vor.u32 %v2355_v12, %v2273_v14  ;;  %v2208_v18 = vor.u32 %v2340_v16, %v2207_v15  ;;  %v2271_v19 = vld [vmem:[#allocation7 + $0xd0] sm:$0xf]  ;;  %v2356_v20 = vld [vmem:[#allocation7 + $0xd4] sm:$0xf0]  ;;  %v350_v22 = vld [vmem:[%s2687_s24 + $0x60] sm:$0xff] }
  0x51   : > { %906 = vmatpush.bf16.msra.mxu3 %v2108_v39  ;;  %640 = vmatmul.bf16.vlgmr.msra.gmra.mxu0 %v402_v43  ;;  %v2272_v21 = vor.u32 %v2356_v20, %v2271_v19  ;;  %v352_v23 = vld [vmem:[%s2687_s24 + $0x70] sm:$0xff]  ;;  %v351_v24 = vld [vmem:[%s2687_s24 + $0x68] sm:$0xff]  ;;  %v353_v25 = vld [vmem:[%s2687_s24 + $0x78] sm:$0xff] }
  0x52   : > { %729 = vmatmul.bf16.vlgmr.msra.gmra.mxu1 %v403_v47  ;;  %1282 = vmatpush.bf16.msrb.mxu0 %v2224_v48  ;;  %v408_v26 = vpack.c.bf16 %v352_v23, %v350_v22  ;;  %v409_v27 = vpack.c.bf16 %v353_v25, %v351_v24  ;;  %v354_v28 = vld [vmem:[%s2687_s24 + $0x80] sm:$0xff]  ;;  %v356_v29 = vld [vmem:[%s2687_s24 + $0x90] sm:$0xff]  ;;  %v355_v30 = vld [vmem:[%s2687_s24 + $0x88] sm:$0xff] }
  0x53   : > { %818 = vmatmul.bf16.vlgmr.msra.gmra.mxu2 %v402_v43  ;;  %1371 = vmatpush.bf16.msrb.mxu1 %v2288_v49  ;;  %v357_v31 = vld [vmem:[%s2687_s24 + $0x98] sm:$0xff]  ;;  %v410_v32 = vpack.c.bf16 %v356_v29, %v354_v28  ;;  %v2337_v34 = vld [vmem:[#allocation7 + $0x44] sm:$0xf]  ;;  %v2201_v35 = vld [vmem:[#allocation7 + $0x48] sm:$0xf0] }
  0x54   : > { %1460 = vmatpush.bf16.msrb.mxu2 %v2228_v40  ;;  %907 = vmatmul.bf16.vlgmr.msra.gmra.mxu3 %v403_v47  ;;  %v411_v33 = vpack.c.bf16 %v357_v31, %v355_v30  ;;  %v2353_v36 = vld [vmem:[#allocation7 + $0xc4] sm:$0xf]  ;;  %v2204_v37 = vor.u32 %v2337_v34, %v2201_v35  ;;  %v2265_v38 = vld [vmem:[#allocation7 + $0xc8] sm:$0xf0]  ;;  %v2199_v39 = vld [vmem:[#allocation7 + $0x40] sm:$0xf] }
  0x55   : > { %1549 = vmatpush.bf16.msrb.mxu3 %v2292_v44  ;;  %v2338_v40 = vld [vmem:[#allocation7 + $0x44] sm:$0xf0]  ;;  %v2268_v41 = vor.u32 %v2353_v36, %v2265_v38  ;;  %v2263_v43 = vld [vmem:[#allocation7 + $0xc0] sm:$0xf]  ;;  %v360_v47 = vld [vmem:[%s2687_s24 + $0xb0] sm:$0xff] }
  0x56   : > { %1283 = vmatpush.bf16.msrb.mxu0 %v2216_v58  ;;  %v2200_v42 = vor.u32 %v2338_v40, %v2199_v39  ;;  %v2354_v44 = vld [vmem:[#allocation7 + $0xc4] sm:$0xf0]  ;;  %v358_v46 = vld [vmem:[%s2687_s24 + $0xa0] sm:$0xff]  ;;  %v361_v49 = vld [vmem:[%s2687_s24 + $0xb8] sm:$0xff] }
  0x57   : > { %1372 = vmatpush.bf16.msrb.mxu1 %v2280_v61  ;;  %v2264_v45 = vor.u32 %v2354_v44, %v2263_v43  ;;  %v359_v48 = vld [vmem:[%s2687_s24 + $0xa8] sm:$0xff]  ;;  %v412_v50 = vpack.c.bf16 %v360_v47, %v358_v46  ;;  %v362_v52 = vld [vmem:[%s2687_s24 + $0xc0] sm:$0xff]  ;;  %v365_v55 = vld [vmem:[%s2687_s24 + $0xd8] sm:$0xff] }
  0x58   : > { %1461 = vmatpush.bf16.msrb.mxu2 %v2220_v53  ;;  %v413_v51 = vpack.c.bf16 %v361_v49, %v359_v48  ;;  %v364_v53 = vld [vmem:[%s2687_s24 + $0xd0] sm:$0xff]  ;;  %v363_v54 = vld [vmem:[%s2687_s24 + $0xc8] sm:$0xff]  ;;  %v2193_v59 = vld [vmem:[#allocation7 + $0x38] sm:$0xf0] }
  0x59   : > { %1550 = vmatpush.bf16.msrb.mxu3 %v2284_v57  ;;  %v414_v56 = vpack.c.bf16 %v364_v53, %v362_v52  ;;  %v415_v57 = vpack.c.bf16 %v365_v55, %v363_v54  ;;  %v2335_v58 = vld [vmem:[#allocation7 + $0x34] sm:$0xf]  ;;  %v2257_v62 = vld [vmem:[#allocation7 + $0xb8] sm:$0xf0]  ;;  %v366_v0 = vld [vmem:[%s2687_s24 + $0xe0] sm:$0xff] }
  0x5a   : > { %1284 = vmatpush.bf16.msrb.mxu0 %v2208_v18  ;;  %v2351_v60 = vld [vmem:[#allocation7 + $0xb4] sm:$0xf]  ;;  %v2196_v61 = vor.u32 %v2335_v58, %v2193_v59  ;;  %v2191_v5 = vld [vmem:[#allocation7 + $0x30] sm:$0xf]  ;;  %v2336_v6 = vld [vmem:[#allocation7 + $0x34] sm:$0xf0] }
  0x5b   : > { %1373 = vmatpush.bf16.msrb.mxu1 %v2272_v21  ;;  %v2260_v63 = vor.u32 %v2351_v60, %v2257_v62  ;;  %v368_v1 = vld [vmem:[%s2687_s24 + $0xf0] sm:$0xff]  ;;  %v2352_v10 = vld [vmem:[#allocation7 + $0xb4] sm:$0xf0]  ;;  %v466_v12 = vld [vmem:[%s3222_s2] sm:$0x3] }
  0x5c   : > { %1462 = vmatpush.bf16.msrb.mxu2 %v2212_v13  ;;  %v416_v4 = vpack.c.bf16 %v368_v1, %v366_v0  ;;  %v2255_v7 = vld [vmem:[#allocation7 + $0xb0] sm:$0xf]  ;;  %v370_v13 = vld [vmem:[%s2687_s24 + $0x100] sm:$0xff]  ;;  %v2734_v15 = vperm.slane %v466_v12, 0  ;;  %v371_v16 = vld [vmem:[%s2687_s24 + $0x108] sm:$0xff]  ;;  %v2739_v24 = vperm.slane %v466_v12, 1 }
  0x5d   : > { %1551 = vmatpush.bf16.msrb.mxu3 %v2276_v17  ;;  %v2256_v11 = vor.u32 %v2352_v10, %v2255_v7  ;;  %v372_v14 = vld [vmem:[%s2687_s24 + $0x110] sm:$0xff]  ;;  %v373_v17 = vld [vmem:[%s2687_s24 + $0x118] sm:$0xff]  ;;  %v2333_v25 = vld [vmem:[#allocation7 + $0x24] sm:$0xf] }
  0x5e   : > { %1285 = vmatpush.bf16.msrb.mxu0 %v2200_v42  ;;  %v418_v18 = vpack.c.bf16 %v372_v14, %v370_v13  ;;  %v419_v20 = vpack.c.bf16 %v373_v17, %v371_v16  ;;  %v2349_v28 = vld [vmem:[#allocation7 + $0xa4] sm:$0xf]  ;;  %v2249_v29 = vld [vmem:[#allocation7 + $0xa8] sm:$0xf0]  ;;  %v376_v40 = vld [vmem:[%s2687_s24 + $0x130] sm:$0xff] }
  0x5f   : > { %1374 = vmatpush.bf16.msrb.mxu1 %v2264_v45  ;;  %v2252_v31 = vor.u32 %v2349_v28, %v2249_v29  ;;  %v374_v39 = vld [vmem:[%s2687_s24 + $0x120] sm:$0xff]  ;;  %v377_v42 = vld [vmem:[%s2687_s24 + $0x138] sm:$0xff]  ;;  %v2334_v46 = vld [vmem:[#allocation7 + $0x24] sm:$0xf0] }
  0x60   : > { %1463 = vmatpush.bf16.msrb.mxu2 %v2204_v37  ;;  %v2183_v45 = vld [vmem:[#allocation7 + $0x20] sm:$0xf]  ;;  %v2350_v49 = vld [vmem:[#allocation7 + $0xa4] sm:$0xf0]  ;;  %v420_v52 = vpack.c.bf16 %v376_v40, %v374_v39  ;;  %v380_v10 = vld [vmem:[%s2687_s24 + $0x150] sm:$0xff] }
  0x61   : > { %645 = vmatmul.bf16.gmra.mxu0 %v404_v2  ;;  %1552 = vmatpush.bf16.msrb.mxu3 %v2268_v41  ;;  %v375_v41 = vld [vmem:[%s2687_s24 + $0x128] sm:$0xff]  ;;  %v2184_v47 = vor.u32 %v2334_v46, %v2183_v45  ;;  %v2247_v48 = vld [vmem:[#allocation7 + $0xa0] sm:$0xf]  ;;  %v381_v14 = vld [vmem:[%s2687_s24 + $0x158] sm:$0xff] }
  0x62   : > { %734 = vmatmul.bf16.gmra.mxu1 %v405_v3  ;;  %v2248_v53 = vor.u32 %v2350_v49, %v2247_v48  ;;  %v379_v13 = vld [vmem:[%s2687_s24 + $0x148] sm:$0xff]  ;;  %v382_v45 = vld [vmem:[%s2687_s24 + $0x160] sm:$0xff]  ;;  %v384_v46 = vld [vmem:[%s2687_s24 + $0x170] sm:$0xff] }
  0x63   : > { %823 = vmatmul.bf16.gmra.mxu2 %v404_v2  ;;  %v367_v2 = vld [vmem:[%s2687_s24 + $0xe8] sm:$0xff]  ;;  %1375 = vmatpush.bf16.msrb.mxu1 %v2256_v11  ;;  %v385_v48 = vld [vmem:[%s2687_s24 + $0x178] sm:$0xff] }
  0x64   : > { %912 = vmatmul.bf16.gmra.mxu3 %v405_v3  ;;  %1464 = vmatpush.bf16.msrb.mxu2 %v2196_v61  ;;  %v369_v3 = vld [vmem:[%s2687_s24 + $0xf8] sm:$0xff] }
  0x65   : > { %1553 = vmatpush.bf16.msrb.mxu3 %v2260_v63 }
  0x67   : > { %1376 = vmatpush.bf16.msrb.mxu1 %v2248_v53  ;;  %v2332_v53 = vld [vmem:[#allocation7 + $0x14] sm:$0xf0] }
  0x69   : > { %1554 = vmatpush.bf16.msrb.mxu3 %v2252_v31  ;;  %v2177_v31 = vld [vmem:[#allocation7 + $0x18] sm:$0xf0] }
  0x71   : > { %650 = vmatmul.bf16.gmra.mxu0 %v406_v8 }
  0x72   : > { %739 = vmatmul.bf16.gmra.mxu1 %v407_v9 }
  0x73   : > { %828 = vmatmul.bf16.gmra.mxu2 %v406_v8  ;;  %v417_v8 = vpack.c.bf16 %v369_v3, %v367_v2 }
  0x74   : > { %917 = vmatmul.bf16.gmra.mxu3 %v407_v9  ;;  %v2192_v9 = vor.u32 %v2336_v6, %v2191_v5 }
  0x76   : > { %1286 = vmatpush.bf16.msrb.mxu0 %v2192_v9  ;;  %v378_v9 = vld [vmem:[%s2687_s24 + $0x140] sm:$0xff] }
  0x77   : > { %v422_v17 = vpack.c.bf16 %v380_v10, %v378_v9 }
  0x7a   : > { %1287 = vmatpush.bf16.msrb.mxu0 %v2184_v47  ;;  %v383_v47 = vld [vmem:[%s2687_s24 + $0x168] sm:$0xff] }
  0x81   : > { %655 = vmatmul.bf16.gmra.mxu0 %v408_v26 }
  0x82   : > { %744 = vmatmul.bf16.gmra.mxu1 %v409_v27 }
  0x83   : > { %833 = vmatmul.bf16.gmra.mxu2 %v408_v26  ;;  %v2185_v26 = vld [vmem:[#allocation7 + $0x28] sm:$0xf0] }
  0x84   : > { %922 = vmatmul.bf16.gmra.mxu3 %v409_v27  ;;  %v2188_v27 = vor.u32 %v2333_v25, %v2185_v26 }
  0x86   : > { %1465 = vmatpush.bf16.msrb.mxu2 %v2188_v27 }
  0x91   : > { %660 = vmatmul.bf16.gmra.mxu0 %v410_v32 }
  0x92   : > { %749 = vmatmul.bf16.gmra.mxu1 %v411_v33 }
  0x93   : > { %838 = vmatmul.bf16.gmra.mxu2 %v410_v32 }
  0x94   : > { %927 = vmatmul.bf16.gmra.mxu3 %v411_v33 }
  0xa1   : > { %665 = vmatmul.bf16.gmra.mxu0 %v412_v50 }
  0xa2   : > { %754 = vmatmul.bf16.gmra.mxu1 %v413_v51 }
  0xa3   : > { %843 = vmatmul.bf16.gmra.mxu2 %v412_v50 }
  0xa4   : > { %932 = vmatmul.bf16.gmra.mxu3 %v413_v51 }
  0xb1   : > { %670 = vmatmul.bf16.gmra.mxu0 %v414_v56 }
  0xb2   : > { %759 = vmatmul.bf16.gmra.mxu1 %v415_v57 }
  0xb3   : > { %848 = vmatmul.bf16.gmra.mxu2 %v414_v56 }
  0xb4   : > { %937 = vmatmul.bf16.gmra.mxu3 %v415_v57  ;;  %v421_v57 = vpack.c.bf16 %v377_v42, %v375_v41 }
  0xc1   : > { %675 = vmatmul.bf16.gmra.mxu0 %v416_v4 }
  0xc2   : > { %764 = vmatmul.bf16.gmra.mxu1 %v417_v8 }
  0xc3   : > { %853 = vmatmul.bf16.gmra.mxu2 %v416_v4 }
  0xc4   : > { %942 = vmatmul.bf16.gmra.mxu3 %v417_v8 }
  0xce   : > { %v641_v19 = vpop.f32.mrf.mxu0 }
  0xcf   : > { %v642_v21 = vadd.f32 %v641_v19, %v2734_v15  ;;  %v730_v22 = vpop.f32.mrf.mxu1 }
  0xd1   : > { %v731_v23 = vadd.f32 %v730_v22, %v642_v21  ;;  %680 = vmatmul.bf16.gmra.mxu0 %v418_v18  ;;  %v423_v22 = vpack.c.bf16 %v381_v14, %v379_v13 }
  0xd2   : > { %769 = vmatmul.bf16.gmra.mxu1 %v419_v20 }
  0xd3   : > { %858 = vmatmul.bf16.gmra.mxu2 %v418_v18  ;;  %v988_v43 = vmax.f32 %v731_v23, 0.0 }
  0xd4   : > { %947 = vmatmul.bf16.gmra.mxu3 %v419_v20 }
  0xd6   : > { %v819_v30 = vpop.f32.mrf.mxu2  ;;  %v643_v34 = vpop.f32.mrf.mxu0 }
  0xd7   : > { %v820_v32 = vadd.f32 %v819_v30, %v2739_v24  ;;  %v908_v33 = vpop.f32.mrf.mxu3  ;;  %v644_v35 = vadd.f32 %v643_v34, %v2734_v15  ;;  %v732_v36 = vpop.f32.mrf.mxu1  ;;  %v2331_v30 = vld [vmem:[#allocation7 + $0x14] sm:$0xf]  ;;  %v2241_v34 = vld [vmem:[#allocation7 + $0x98] sm:$0xf0] }
  0xd9   : > { %v909_v37 = vadd.f32 %v908_v33, %v820_v32  ;;  %v733_v38 = vadd.f32 %v732_v36, %v644_v35  ;;  %v2180_v32 = vor.u32 %v2331_v30, %v2177_v31  ;;  %v2347_v33 = vld [vmem:[#allocation7 + $0x94] sm:$0xf] }
  0xdb   : > { %v990_v44 = vmax.f32 %v733_v38, 0.0  ;;  %v989_v62 = vmax.f32 %v909_v37, 0.0  ;;  %v2244_v37 = vor.u32 %v2347_v33, %v2241_v34  ;;  %1466 = vmatpush.bf16.msrb.mxu2 %v2180_v32 }
  0xdd   : > { %v2747_v50 = vpack.c.bf16 %v990_v44, %v988_v43  ;;  %1555 = vmatpush.bf16.msrb.mxu3 %v2244_v37 }
  0xde   : > { %v821_v51 = vpop.f32.mrf.mxu2  ;;  %v646_v56 = vpop.f32.mrf.mxu0 }
  0xdf   : > { %v822_v54 = vadd.f32 %v821_v51, %v2739_v24  ;;  %v910_v55 = vpop.f32.mrf.mxu3  ;;  %v647_v58 = vadd.f32 %v646_v56, %v2734_v15  ;;  %v735_v59 = vpop.f32.mrf.mxu1  ;;  %v2348_v56 = vld [vmem:[#allocation7 + $0x94] sm:$0xf0] }
  0xe1   : > { %v911_v60 = vadd.f32 %v910_v55, %v822_v54  ;;  %v736_v61 = vadd.f32 %v735_v59, %v647_v58  ;;  %685 = vmatmul.bf16.gmra.mxu0 %v420_v52  ;;  %v2239_v55 = vld [vmem:[#allocation7 + $0x90] sm:$0xf]  ;;  %v424_v58 = vpack.c.bf16 %v384_v46, %v382_v45 }
  0xe2   : > { %774 = vmatmul.bf16.gmra.mxu1 %v421_v57  ;;  %v2240_v59 = vor.u32 %v2348_v56, %v2239_v55  ;;  %v390_v56 = vld [vmem:[%s2687_s24 + $0x1a0] sm:$0xff] }
  0xe3   : > { %v991_v63 = vmax.f32 %v911_v60, 0.0  ;;  %863 = vmatmul.bf16.gmra.mxu2 %v420_v52  ;;  %v992_v11 = vmax.f32 %v736_v61, 0.0  ;;  %v2175_v52 = vld [vmem:[#allocation7 + $0x10] sm:$0xf] }
  0xe4   : > { %952 = vmatmul.bf16.gmra.mxu3 %v421_v57  ;;  %v2176_v54 = vor.u32 %v2332_v53, %v2175_v52  ;;  %1377 = vmatpush.bf16.msrb.mxu1 %v2240_v59  ;;  %v393_v59 = vld [vmem:[%s2687_s24 + $0x1b8] sm:$0xff] }
  0xe5   : > { %v2751_v0 = vpack.c.bf16 %v991_v63, %v989_v62 }
  0xe6   : > { %v824_v1 = vpop.f32.mrf.mxu2  ;;  %v648_v4 = vpop.f32.mrf.mxu0  ;;  %1288 = vmatpush.bf16.msrb.mxu0 %v2176_v54 }
  0xe7   : > { %v825_v2 = vadd.f32 %v824_v1, %v2739_v24  ;;  %v913_v3 = vpop.f32.mrf.mxu3  ;;  %v649_v5 = vadd.f32 %v648_v4, %v2734_v15  ;;  %v737_v6 = vpop.f32.mrf.mxu1  ;;  %v425_v1 = vpack.c.bf16 %v385_v48, %v383_v47 }
  0xe9   : > { %v914_v7 = vadd.f32 %v913_v3, %v825_v2  ;;  %v738_v8 = vadd.f32 %v737_v6, %v649_v5 }
  0xeb   : > { %v994_v12 = vmax.f32 %v738_v8, 0.0  ;;  %v993_v28 = vmax.f32 %v914_v7, 0.0 }
  0xed   : > { %v2759_v18 = vpack.c.bf16 %v994_v12, %v992_v11 }
  0xee   : > { %v826_v16 = vpop.f32.mrf.mxu2  ;;  %v651_v21 = vpop.f32.mrf.mxu0 }
  0xef   : > { %v827_v19 = vadd.f32 %v826_v16, %v2739_v24  ;;  %v915_v20 = vpop.f32.mrf.mxu3  ;;  %v652_v23 = vadd.f32 %v651_v21, %v2734_v15  ;;  %v740_v25 = vpop.f32.mrf.mxu1 }
  0xf1   : > { %v916_v26 = vadd.f32 %v915_v20, %v827_v19  ;;  %v741_v27 = vadd.f32 %v740_v25, %v652_v23  ;;  %690 = vmatmul.bf16.gmra.mxu0 %v422_v17  ;;  %v386_v19 = vld [vmem:[%s2687_s24 + $0x180] sm:$0xff]  ;;  %v388_v20 = vld [vmem:[%s2687_s24 + $0x190] sm:$0xff]  ;;  %v387_v23 = vld [vmem:[%s2687_s24 + $0x188] sm:$0xff] }
  0xf2   : > { %779 = vmatmul.bf16.gmra.mxu1 %v423_v22  ;;  %v389_v25 = vld [vmem:[%s2687_s24 + $0x198] sm:$0xff] }
  0xf3   : > { %v995_v29 = vmax.f32 %v916_v26, 0.0  ;;  %868 = vmatmul.bf16.gmra.mxu2 %v422_v17  ;;  %v996_v49 = vmax.f32 %v741_v27, 0.0  ;;  %v426_v27 = vpack.c.bf16 %v388_v20, %v386_v19  ;;  %v427_v32 = vpack.c.bf16 %v389_v25, %v387_v23 }
  0xf4   : > { %957 = vmatmul.bf16.gmra.mxu3 %v423_v22 }
  0xf5   : > { %v2763_v35 = vpack.c.bf16 %v995_v29, %v993_v28 }
  0xf6   : > { %v829_v36 = vpop.f32.mrf.mxu2  ;;  %v653_v40 = vpop.f32.mrf.mxu0 }
  0xf7   : > { %v830_v38 = vadd.f32 %v829_v36, %v2739_v24  ;;  %v918_v39 = vpop.f32.mrf.mxu3  ;;  %v654_v41 = vadd.f32 %v653_v40, %v2734_v15  ;;  %v742_v42 = vpop.f32.mrf.mxu1  ;;  %v2329_v40 = vld [vmem:[#allocation7 + $0x4] sm:$0xf] }
  0xf9   : > { %v919_v43 = vadd.f32 %v918_v39, %v830_v38  ;;  %v743_v44 = vadd.f32 %v742_v42, %v654_v41  ;;  %v2169_v41 = vld [vmem:[#allocation7 + $0x8] sm:$0xf0] }
  0xfa   : > { %v2172_v42 = vor.u32 %v2329_v40, %v2169_v41 }
  0xfb   : > { %v998_v51 = vmax.f32 %v743_v44, 0.0  ;;  %v997_v6 = vmax.f32 %v919_v43, 0.0  ;;  %v2345_v43 = vld [vmem:[#allocation7 + $0x84] sm:$0xf]  ;;  %v2233_v44 = vld [vmem:[#allocation7 + $0x88] sm:$0xf0] }
  0xfc   : > { %v2236_v47 = vor.u32 %v2345_v43, %v2233_v44  ;;  %1467 = vmatpush.bf16.msrb.mxu2 %v2172_v42 }
  0xfd   : > { %v2771_v60 = vpack.c.bf16 %v998_v51, %v996_v49 }
  0xfe   : > { %v831_v57 = vpop.f32.mrf.mxu2  ;;  %v656_v63 = vpop.f32.mrf.mxu0  ;;  %1556 = vmatpush.bf16.msrb.mxu3 %v2236_v47 }
  0xff   : > { %v832_v61 = vadd.f32 %v831_v57, %v2739_v24  ;;  %v920_v62 = vpop.f32.mrf.mxu3  ;;  %v657_v2 = vadd.f32 %v656_v63, %v2734_v15  ;;  %v745_v3 = vpop.f32.mrf.mxu1  ;;  %v392_v57 = vld [vmem:[%s2687_s24 + $0x1b0] sm:$0xff]  ;;  %v2167_v63 = vld [vmem:[#allocation7] sm:$0xf] }
 0x101   : > { %v921_v4 = vadd.f32 %v920_v62, %v832_v61  ;;  %v746_v5 = vadd.f32 %v745_v3, %v657_v2  ;;  %695 = vmatmul.bf16.gmra.mxu0 %v424_v58  ;;  %v2231_v3 = vld [vmem:[#allocation7 + $0x80] sm:$0xf] }
 0x102   : > { %784 = vmatmul.bf16.gmra.mxu1 %v425_v1 }
 0x103   : > { %v999_v7 = vmax.f32 %v921_v4, 0.0  ;;  %873 = vmatmul.bf16.gmra.mxu2 %v424_v58  ;;  %v1000_v21 = vmax.f32 %v746_v5, 0.0  ;;  %v391_v58 = vld [vmem:[%s2687_s24 + $0x1a8] sm:$0xff] }
 0x104   : > { %962 = vmatmul.bf16.gmra.mxu3 %v425_v1  ;;  %v2330_v1 = vld [vmem:[#allocation7 + $0x4] sm:$0xf0] }
 0x105   : > { %v2775_v8 = vpack.c.bf16 %v999_v7, %v997_v6  ;;  %v2168_v2 = vor.u32 %v2330_v1, %v2167_v63  ;;  %v2346_v4 = vld [vmem:[#allocation7 + $0x84] sm:$0xf0]  ;;  %v428_v6 = vpack.c.bf16 %v392_v57, %v390_v56 }
 0x106   : > { %v834_v9 = vpop.f32.mrf.mxu2  ;;  %v658_v12 = vpop.f32.mrf.mxu0  ;;  %v2232_v7 = vor.u32 %v2346_v4, %v2231_v3  ;;  %v400_v3 = vld [vmem:[%s2687_s24 + $0x1f0] sm:$0xff] }
 0x107   : > { %v835_v10 = vadd.f32 %v834_v9, %v2739_v24  ;;  %v923_v11 = vpop.f32.mrf.mxu3  ;;  %v659_v13 = vadd.f32 %v658_v12, %v2734_v15  ;;  %v747_v14 = vpop.f32.mrf.mxu1  ;;  %1289 = vmatpush.bf16.msrb.mxu0 %v2168_v2  ;;  %v398_v2 = vld [vmem:[%s2687_s24 + $0x1e0] sm:$0xff] }
 0x108   : > { %1378 = vmatpush.bf16.msrb.mxu1 %v2232_v7  ;;  %v401_v7 = vld [vmem:[%s2687_s24 + $0x1f8] sm:$0xff] }
 0x109   : > { %v924_v16 = vadd.f32 %v923_v11, %v835_v10  ;;  %v748_v17 = vadd.f32 %v747_v14, %v659_v13  ;;  %v429_v13 = vpack.c.bf16 %v393_v59, %v391_v58 }
 0x10b   : > { %v1002_v22 = vmax.f32 %v748_v17, 0.0  ;;  %v1001_v38 = vmax.f32 %v924_v16, 0.0 }
 0x10d   : > { %v2783_v28 = vpack.c.bf16 %v1002_v22, %v1000_v21 }
 0x10e   : > { %v836_v26 = vpop.f32.mrf.mxu2  ;;  %v661_v31 = vpop.f32.mrf.mxu0 }
 0x10f   : > { %v837_v29 = vadd.f32 %v836_v26, %v2739_v24  ;;  %v925_v30 = vpop.f32.mrf.mxu3  ;;  %v662_v33 = vadd.f32 %v661_v31, %v2734_v15  ;;  %v750_v34 = vpop.f32.mrf.mxu1 }
 0x111   : > { %v926_v36 = vadd.f32 %v925_v30, %v837_v29  ;;  %v751_v37 = vadd.f32 %v750_v34, %v662_v33  ;;  %700 = vmatmul.bf16.gmra.mxu0 %v426_v27  ;;  %v394_v33 = vld [vmem:[%s2687_s24 + $0x1c0] sm:$0xff]  ;;  %v396_v34 = vld [vmem:[%s2687_s24 + $0x1d0] sm:$0xff] }
 0x112   : > { %789 = vmatmul.bf16.gmra.mxu1 %v427_v32  ;;  %v430_v41 = vpack.c.bf16 %v396_v34, %v394_v33 }
 0x113   : > { %v1003_v39 = vmax.f32 %v926_v36, 0.0  ;;  %878 = vmatmul.bf16.gmra.mxu2 %v426_v27  ;;  %v1004_v61 = vmax.f32 %v751_v37, 0.0 }
 0x114   : > { %967 = vmatmul.bf16.gmra.mxu3 %v427_v32 }
 0x115   : > { %v2787_v45 = vpack.c.bf16 %v1003_v39, %v1001_v38  ;;  %v395_v38 = vld [vmem:[%s2687_s24 + $0x1c8] sm:$0xff]  ;;  %v397_v39 = vld [vmem:[%s2687_s24 + $0x1d8] sm:$0xff] }
 0x116   : > { %v839_v46 = vpop.f32.mrf.mxu2  ;;  %v663_v51 = vpop.f32.mrf.mxu0  ;;  %v431_v47 = vpack.c.bf16 %v397_v39, %v395_v38 }
 0x117   : > { %v840_v48 = vadd.f32 %v839_v46, %v2739_v24  ;;  %v928_v49 = vpop.f32.mrf.mxu3  ;;  %v664_v52 = vadd.f32 %v663_v51, %v2734_v15  ;;  %v752_v53 = vpop.f32.mrf.mxu1 }
 0x119   : > { %v929_v54 = vadd.f32 %v928_v49, %v840_v48  ;;  %v753_v55 = vadd.f32 %v752_v53, %v664_v52 }
 0x11b   : > { %v1006_v62 = vmax.f32 %v753_v55, 0.0  ;;  %v1005_v20 = vmax.f32 %v929_v54, 0.0 }
 0x11d   : > { %v2795_v9 = vpack.c.bf16 %v1006_v62, %v1004_v61 }
 0x11e   : > { %v841_v5 = vpop.f32.mrf.mxu2  ;;  %v666_v12 = vpop.f32.mrf.mxu0 }
 0x11f   : > { %v842_v10 = vadd.f32 %v841_v5, %v2739_v24  ;;  %v930_v11 = vpop.f32.mrf.mxu3  ;;  %v667_v14 = vadd.f32 %v666_v12, %v2734_v15  ;;  %v755_v16 = vpop.f32.mrf.mxu1 }
 0x121   : > { %v931_v17 = vadd.f32 %v930_v11, %v842_v10  ;;  %v756_v19 = vadd.f32 %v755_v16, %v667_v14  ;;  %705 = vmatmul.bf16.gmra.mxu0 %v428_v6  ;;  %v432_v11 = vpack.c.bf16 %v400_v3, %v398_v2 }
 0x122   : > { %794 = vmatmul.bf16.gmra.mxu1 %v429_v13 }
 0x123   : > { %v1007_v21 = vmax.f32 %v931_v17, 0.0  ;;  %883 = vmatmul.bf16.gmra.mxu2 %v428_v6  ;;  %v1008_v36 = vmax.f32 %v756_v19, 0.0  ;;  %v399_v6 = vld [vmem:[%s2687_s24 + $0x1e8] sm:$0xff] }
 0x124   : > { %972 = vmatmul.bf16.gmra.mxu3 %v429_v13  ;;  %v433_v17 = vpack.c.bf16 %v401_v7, %v399_v6 }
 0x125   : > { %v2799_v22 = vpack.c.bf16 %v1007_v21, %v1005_v20 }
 0x126   : > { %v844_v23 = vpop.f32.mrf.mxu2  ;;  %v668_v27 = vpop.f32.mrf.mxu0 }
 0x127   : > { %v845_v25 = vadd.f32 %v844_v23, %v2739_v24  ;;  %v933_v26 = vpop.f32.mrf.mxu3  ;;  %v669_v29 = vadd.f32 %v668_v27, %v2734_v15  ;;  %v757_v30 = vpop.f32.mrf.mxu1 }
 0x129   : > { %v934_v31 = vadd.f32 %v933_v26, %v845_v25  ;;  %v758_v32 = vadd.f32 %v757_v30, %v669_v29 }
 0x12b   : > { %v1010_v37 = vmax.f32 %v758_v32, 0.0  ;;  %v1009_v53 = vmax.f32 %v934_v31, 0.0 }
 0x12d   : > { %v2807_v42 = vpack.c.bf16 %v1010_v37, %v1008_v36 }
 0x12e   : > { %v846_v40 = vpop.f32.mrf.mxu2  ;;  %v671_v46 = vpop.f32.mrf.mxu0 }
 0x12f   : > { %v847_v43 = vadd.f32 %v846_v40, %v2739_v24  ;;  %v935_v44 = vpop.f32.mrf.mxu3  ;;  %v672_v48 = vadd.f32 %v671_v46, %v2734_v15  ;;  %v760_v49 = vpop.f32.mrf.mxu1 }
 0x131   : > { %v936_v51 = vadd.f32 %v935_v44, %v847_v43  ;;  %v761_v52 = vadd.f32 %v760_v49, %v672_v48  ;;  %710 = vmatmul.bf16.gmra.mxu0 %v430_v41 }
 0x132   : > { %799 = vmatmul.bf16.gmra.mxu1 %v431_v47 }
 0x133   : > { %v1011_v54 = vmax.f32 %v936_v51, 0.0  ;;  %888 = vmatmul.bf16.gmra.mxu2 %v430_v41  ;;  %v1012_v4 = vmax.f32 %v761_v52, 0.0 }
 0x134   : > { %977 = vmatmul.bf16.gmra.mxu3 %v431_v47 }
 0x135   : > { %v2811_v55 = vpack.c.bf16 %v1011_v54, %v1009_v53 }
 0x136   : > { %v849_v56 = vpop.f32.mrf.mxu2  ;;  %v673_v59 = vpop.f32.mrf.mxu0 }
 0x137   : > { %v850_v57 = vadd.f32 %v849_v56, %v2739_v24  ;;  %v938_v58 = vpop.f32.mrf.mxu3  ;;  %v674_v61 = vadd.f32 %v673_v59, %v2734_v15  ;;  %v762_v62 = vpop.f32.mrf.mxu1 }
 0x139   : > { %v939_v63 = vadd.f32 %v938_v58, %v850_v57  ;;  %v763_v1 = vadd.f32 %v762_v62, %v674_v61 }
 0x13b   : > { %v1014_v5 = vmax.f32 %v763_v1, 0.0  ;;  %v1013_v25 = vmax.f32 %v939_v63, 0.0 }
 0x13d   : > { %v2819_v12 = vpack.c.bf16 %v1014_v5, %v1012_v4 }
 0x13e   : > { %v851_v10 = vpop.f32.mrf.mxu2  ;;  %v676_v16 = vpop.f32.mrf.mxu0 }
 0x13f   : > { %v852_v13 = vadd.f32 %v851_v10, %v2739_v24  ;;  %v940_v14 = vpop.f32.mrf.mxu3  ;;  %v677_v19 = vadd.f32 %v676_v16, %v2734_v15  ;;  %v765_v20 = vpop.f32.mrf.mxu1 }
 0x141   : > { %v941_v21 = vadd.f32 %v940_v14, %v852_v13  ;;  %v766_v23 = vadd.f32 %v765_v20, %v677_v19  ;;  %715 = vmatmul.bf16.gmra.mxu0 %v432_v11 }
 0x142   : > { %804 = vmatmul.bf16.gmra.mxu1 %v433_v17 }
 0x143   : > { %v1015_v26 = vmax.f32 %v941_v21, 0.0  ;;  %893 = vmatmul.bf16.gmra.mxu2 %v432_v11  ;;  %v1016_v38 = vmax.f32 %v766_v23, 0.0 }
 0x144   : > { %982 = vmatmul.bf16.gmra.mxu3 %v433_v17 }
 0x145   : > { %v2823_v27 = vpack.c.bf16 %v1015_v26, %v1013_v25 }
 0x146   : > { %v854_v29 = vpop.f32.mrf.mxu2  ;;  %v678_v32 = vpop.f32.mrf.mxu0 }
 0x147   : > { %v855_v30 = vadd.f32 %v854_v29, %v2739_v24  ;;  %v943_v31 = vpop.f32.mrf.mxu3  ;;  %v679_v33 = vadd.f32 %v678_v32, %v2734_v15  ;;  %v767_v34 = vpop.f32.mrf.mxu1 }
 0x149   : > { %v944_v36 = vadd.f32 %v943_v31, %v855_v30  ;;  %v768_v37 = vadd.f32 %v767_v34, %v679_v33 }
 0x14b   : > { %v1018_v39 = vmax.f32 %v768_v37, 0.0  ;;  %v1017_v52 = vmax.f32 %v944_v36, 0.0 }
 0x14d   : > { %v2827_v41 = vpack.c.bf16 %v1018_v39, %v1016_v38 }
 0x14e   : > { %v856_v40 = vpop.f32.mrf.mxu2  ;;  %v681_v46 = vpop.f32.mrf.mxu0 }
 0x14f   : > { %v857_v43 = vadd.f32 %v856_v40, %v2739_v24  ;;  %v945_v44 = vpop.f32.mrf.mxu3  ;;  %v682_v47 = vadd.f32 %v681_v46, %v2734_v15  ;;  %v770_v48 = vpop.f32.mrf.mxu1 }
 0x151   : > { %v946_v49 = vadd.f32 %v945_v44, %v857_v43  ;;  %v771_v51 = vadd.f32 %v770_v48, %v682_v47  ;;  %1290 = vmatmul.bf16.vlgmr.msrb.gmra.mxu0 %v2747_v50 }
 0x152   : > { %1379 = vmatmul.bf16.vlgmr.msrb.gmra.mxu1 %v2751_v0 }
 0x153   : > { %v1019_v53 = vmax.f32 %v946_v49, 0.0  ;;  %1468 = vmatmul.bf16.vlgmr.msrb.gmra.mxu2 %v2747_v50  ;;  %v1020_v2 = vmax.f32 %v771_v51, 0.0 }
 0x154   : > { %1557 = vmatmul.bf16.vlgmr.msrb.gmra.mxu3 %v2751_v0 }
 0x155   : > { %v2835_v54 = vpack.c.bf16 %v1019_v53, %v1017_v52 }
 0x156   : > { %v859_v56 = vpop.f32.mrf.mxu2  ;;  %v683_v59 = vpop.f32.mrf.mxu0 }
 0x157   : > { %v860_v57 = vadd.f32 %v859_v56, %v2739_v24  ;;  %v948_v58 = vpop.f32.mrf.mxu3  ;;  %v684_v61 = vadd.f32 %v683_v59, %v2734_v15  ;;  %v772_v62 = vpop.f32.mrf.mxu1 }
 0x159   : > { %v949_v63 = vadd.f32 %v948_v58, %v860_v57  ;;  %v773_v1 = vadd.f32 %v772_v62, %v684_v61 }
 0x15b   : > { %v1022_v3 = vmax.f32 %v773_v1, 0.0  ;;  %v1021_v14 = vmax.f32 %v949_v63, 0.0 }
 0x15d   : > { %v2839_v5 = vpack.c.bf16 %v1022_v3, %v1020_v2 }
 0x15e   : > { %v861_v4 = vpop.f32.mrf.mxu2  ;;  %v686_v6 = vpop.f32.mrf.mxu0 }
 0x15f   : > { %v862_v50 = vadd.f32 %v861_v4, %v2739_v24  ;;  %v950_v0 = vpop.f32.mrf.mxu3  ;;  %v687_v7 = vadd.f32 %v686_v6, %v2734_v15  ;;  %v775_v10 = vpop.f32.mrf.mxu1 }
 0x161   : > { %v951_v11 = vadd.f32 %v950_v0, %v862_v50  ;;  %v776_v13 = vadd.f32 %v775_v10, %v687_v7  ;;  %1295 = vmatmul.bf16.gmra.mxu0 %v2759_v18 }
 0x162   : > { %1384 = vmatmul.bf16.gmra.mxu1 %v2763_v35 }
 0x163   : > { %v1023_v16 = vmax.f32 %v951_v11, 0.0  ;;  %1473 = vmatmul.bf16.gmra.mxu2 %v2759_v18  ;;  %v1024_v31 = vmax.f32 %v776_v13, 0.0 }
 0x164   : > { %1562 = vmatmul.bf16.gmra.mxu3 %v2763_v35 }
 0x165   : > { %v2847_v17 = vpack.c.bf16 %v1023_v16, %v1021_v14 }
 0x166   : > { %v864_v19 = vpop.f32.mrf.mxu2  ;;  %v688_v23 = vpop.f32.mrf.mxu0 }
 0x167   : > { %v865_v20 = vadd.f32 %v864_v19, %v2739_v24  ;;  %v953_v21 = vpop.f32.mrf.mxu3  ;;  %v689_v25 = vadd.f32 %v688_v23, %v2734_v15  ;;  %v777_v26 = vpop.f32.mrf.mxu1 }
 0x169   : > { %v954_v29 = vadd.f32 %v953_v21, %v865_v20  ;;  %v778_v30 = vadd.f32 %v777_v26, %v689_v25 }
 0x16b   : > { %v1026_v32 = vmax.f32 %v778_v30, 0.0  ;;  %v1025_v43 = vmax.f32 %v954_v29, 0.0 }
 0x16d   : > { %v2851_v34 = vpack.c.bf16 %v1026_v32, %v1024_v31 }
 0x16e   : > { %v866_v33 = vpop.f32.mrf.mxu2  ;;  %v691_v36 = vpop.f32.mrf.mxu0 }
 0x16f   : > { %v867_v18 = vadd.f32 %v866_v33, %v2739_v24  ;;  %v955_v35 = vpop.f32.mrf.mxu3  ;;  %v692_v37 = vadd.f32 %v691_v36, %v2734_v15  ;;  %v780_v38 = vpop.f32.mrf.mxu1 }
 0x171   : > { %v956_v39 = vadd.f32 %v955_v35, %v867_v18  ;;  %v781_v40 = vadd.f32 %v780_v38, %v692_v37  ;;  %1300 = vmatmul.bf16.gmra.mxu0 %v2771_v60 }
 0x172   : > { %1389 = vmatmul.bf16.gmra.mxu1 %v2775_v8 }
 0x173   : > { %v1027_v44 = vmax.f32 %v956_v39, 0.0  ;;  %1478 = vmatmul.bf16.gmra.mxu2 %v2771_v60  ;;  %v1028_v58 = vmax.f32 %v781_v40, 0.0 }
 0x174   : > { %1567 = vmatmul.bf16.gmra.mxu3 %v2775_v8 }
 0x175   : > { %v2859_v46 = vpack.c.bf16 %v1027_v44, %v1025_v43 }
 0x176   : > { %v869_v47 = vpop.f32.mrf.mxu2  ;;  %v693_v51 = vpop.f32.mrf.mxu0 }
 0x177   : > { %v870_v48 = vadd.f32 %v869_v47, %v2739_v24  ;;  %v958_v49 = vpop.f32.mrf.mxu3  ;;  %v694_v52 = vadd.f32 %v693_v51, %v2734_v15  ;;  %v782_v53 = vpop.f32.mrf.mxu1 }
 0x179   : > { %v959_v56 = vadd.f32 %v958_v49, %v870_v48  ;;  %v783_v57 = vadd.f32 %v782_v53, %v694_v52 }
 0x17b   : > { %v1030_v59 = vmax.f32 %v783_v57, 0.0  ;;  %v1029_v50 = vmax.f32 %v959_v56, 0.0 }
 0x17d   : > { %v2863_v62 = vpack.c.bf16 %v1030_v59, %v1028_v58 }
 0x17e   : > { %v871_v61 = vpop.f32.mrf.mxu2  ;;  %v696_v63 = vpop.f32.mrf.mxu0 }
 0x17f   : > { %v872_v60 = vadd.f32 %v871_v61, %v2739_v24  ;;  %v960_v8 = vpop.f32.mrf.mxu3  ;;  %v697_v1 = vadd.f32 %v696_v63, %v2734_v15  ;;  %v785_v2 = vpop.f32.mrf.mxu1 }
 0x181   : > { %v961_v3 = vadd.f32 %v960_v8, %v872_v60  ;;  %v786_v4 = vadd.f32 %v785_v2, %v697_v1  ;;  %1305 = vmatmul.bf16.gmra.mxu0 %v2783_v28 }
 0x182   : > { %1394 = vmatmul.bf16.gmra.mxu1 %v2787_v45 }
 0x183   : > { %v1031_v0 = vmax.f32 %v961_v3, 0.0  ;;  %1483 = vmatmul.bf16.gmra.mxu2 %v2783_v28  ;;  %v1032_v21 = vmax.f32 %v786_v4, 0.0 }
 0x184   : > { %1572 = vmatmul.bf16.gmra.mxu3 %v2787_v45 }
 0x185   : > { %v2871_v6 = vpack.c.bf16 %v1031_v0, %v1029_v50 }
 0x186   : > { %v874_v7 = vpop.f32.mrf.mxu2  ;;  %v698_v13 = vpop.f32.mrf.mxu0 }
 0x187   : > { %v875_v10 = vadd.f32 %v874_v7, %v2739_v24  ;;  %v963_v11 = vpop.f32.mrf.mxu3  ;;  %v699_v14 = vadd.f32 %v698_v13, %v2734_v15  ;;  %v787_v16 = vpop.f32.mrf.mxu1 }
 0x189   : > { %v964_v19 = vadd.f32 %v963_v11, %v875_v10  ;;  %v788_v20 = vadd.f32 %v787_v16, %v699_v14 }
 0x18b   : > { %v1034_v23 = vmax.f32 %v788_v20, 0.0  ;;  %v1033_v18 = vmax.f32 %v964_v19, 0.0 }
 0x18d   : > { %v2875_v26 = vpack.c.bf16 %v1034_v23, %v1032_v21 }
 0x18e   : > { %v876_v25 = vpop.f32.mrf.mxu2  ;;  %v701_v29 = vpop.f32.mrf.mxu0 }
 0x18f   : > { %v877_v28 = vadd.f32 %v876_v25, %v2739_v24  ;;  %v965_v45 = vpop.f32.mrf.mxu3  ;;  %v702_v30 = vadd.f32 %v701_v29, %v2734_v15  ;;  %v790_v31 = vpop.f32.mrf.mxu1 }
 0x191   : > { %v966_v32 = vadd.f32 %v965_v45, %v877_v28  ;;  %v791_v33 = vadd.f32 %v790_v31, %v702_v30  ;;  %1310 = vmatmul.bf16.gmra.mxu0 %v2795_v9 }
 0x192   : > { %1399 = vmatmul.bf16.gmra.mxu1 %v2799_v22 }
 0x193   : > { %v1035_v35 = vmax.f32 %v966_v32, 0.0  ;;  %1488 = vmatmul.bf16.gmra.mxu2 %v2795_v9  ;;  %v1036_v49 = vmax.f32 %v791_v33, 0.0 }
 0x194   : > { %1577 = vmatmul.bf16.gmra.mxu3 %v2799_v22 }
 0x195   : > { %v2883_v36 = vpack.c.bf16 %v1035_v35, %v1033_v18 }
 0x196   : > { %v879_v37 = vpop.f32.mrf.mxu2  ;;  %v703_v40 = vpop.f32.mrf.mxu0 }
 0x197   : > { %v880_v38 = vadd.f32 %v879_v37, %v2739_v24  ;;  %v968_v39 = vpop.f32.mrf.mxu3  ;;  %v704_v43 = vadd.f32 %v703_v40, %v2734_v15  ;;  %v792_v44 = vpop.f32.mrf.mxu1 }
 0x199   : > { %v969_v47 = vadd.f32 %v968_v39, %v880_v38  ;;  %v793_v48 = vadd.f32 %v792_v44, %v704_v43 }
 0x19b   : > { %v1038_v51 = vmax.f32 %v793_v48, 0.0  ;;  %v1037_v60 = vmax.f32 %v969_v47, 0.0 }
 0x19d   : > { %v2887_v53 = vpack.c.bf16 %v1038_v51, %v1036_v49 }
 0x19e   : > { %v881_v52 = vpop.f32.mrf.mxu2  ;;  %v706_v56 = vpop.f32.mrf.mxu0 }
 0x19f   : > { %v882_v9 = vadd.f32 %v881_v52, %v2739_v24  ;;  %v970_v22 = vpop.f32.mrf.mxu3  ;;  %v707_v57 = vadd.f32 %v706_v56, %v2734_v15  ;;  %v795_v58 = vpop.f32.mrf.mxu1 }
 0x1a1   : > { %v971_v59 = vadd.f32 %v970_v22, %v882_v9  ;;  %v796_v61 = vadd.f32 %v795_v58, %v707_v57  ;;  %1315 = vmatmul.bf16.gmra.mxu0 %v2807_v42 }
 0x1a2   : > { %1404 = vmatmul.bf16.gmra.mxu1 %v2811_v55 }
 0x1a3   : > { %v1039_v8 = vmax.f32 %v971_v59, 0.0  ;;  %1493 = vmatmul.bf16.gmra.mxu2 %v2807_v42  ;;  %v1040_v11 = vmax.f32 %v796_v61, 0.0 }
 0x1a4   : > { %1582 = vmatmul.bf16.gmra.mxu3 %v2811_v55 }
 0x1a5   : > { %v2895_v63 = vpack.c.bf16 %v1039_v8, %v1037_v60 }
 0x1a6   : > { %v884_v1 = vpop.f32.mrf.mxu2  ;;  %v708_v4 = vpop.f32.mrf.mxu0 }
 0x1a7   : > { %v885_v2 = vadd.f32 %v884_v1, %v2739_v24  ;;  %v973_v3 = vpop.f32.mrf.mxu3  ;;  %v709_v50 = vadd.f32 %v708_v4, %v2734_v15  ;;  %v797_v0 = vpop.f32.mrf.mxu1 }
 0x1a9   : > { %v974_v7 = vadd.f32 %v973_v3, %v885_v2  ;;  %v798_v10 = vadd.f32 %v797_v0, %v709_v50  ;;  %v1116_v3 = vld [vmem:[%s3224_s4] sm:$0x3] }
 0x1aa   : > { %v2926_v50 = vperm.slane %v1116_v3, 0 }
 0x1ab   : > { %v1042_v13 = vmax.f32 %v798_v10, 0.0  ;;  %v1041_v28 = vmax.f32 %v974_v7, 0.0 }
 0x1ad   : > { %v2899_v16 = vpack.c.bf16 %v1042_v13, %v1040_v11 }
 0x1ae   : > { %v886_v14 = vpop.f32.mrf.mxu2  ;;  %v711_v19 = vpop.f32.mrf.mxu0 }
 0x1af   : > { %v887_v42 = vadd.f32 %v886_v14, %v2739_v24  ;;  %v975_v55 = vpop.f32.mrf.mxu3  ;;  %v712_v20 = vadd.f32 %v711_v19, %v2734_v15  ;;  %v800_v21 = vpop.f32.mrf.mxu1  ;;  %v2935_v19 = vperm.slane %v1116_v3, 1 }
 0x1b1   : > { %v976_v23 = vadd.f32 %v975_v55, %v887_v42  ;;  %v801_v25 = vadd.f32 %v800_v21, %v712_v20  ;;  %1320 = vmatmul.bf16.gmra.mxu0 %v2819_v12 }
 0x1b2   : > { %1409 = vmatmul.bf16.gmra.mxu1 %v2823_v27 }
 0x1b3   : > { %v1043_v45 = vmax.f32 %v976_v23, 0.0  ;;  %1498 = vmatmul.bf16.gmra.mxu2 %v2819_v12  ;;  %v1044_v39 = vmax.f32 %v801_v25, 0.0 }
 0x1b4   : > { %1587 = vmatmul.bf16.gmra.mxu3 %v2823_v27 }
 0x1b5   : > { %v2907_v29 = vpack.c.bf16 %v1043_v45, %v1041_v28 }
 0x1b6   : > { %v889_v30 = vpop.f32.mrf.mxu2  ;;  %v713_v33 = vpop.f32.mrf.mxu0 }
 0x1b7   : > { %v890_v31 = vadd.f32 %v889_v30, %v2739_v24  ;;  %v978_v32 = vpop.f32.mrf.mxu3  ;;  %v714_v18 = vadd.f32 %v713_v33, %v2734_v15  ;;  %v802_v35 = vpop.f32.mrf.mxu1 }
 0x1b9   : > { %v979_v37 = vadd.f32 %v978_v32, %v890_v31  ;;  %v803_v38 = vadd.f32 %v802_v35, %v714_v18 }
 0x1bb   : > { %v1046_v40 = vmax.f32 %v803_v38, 0.0  ;;  %v1045_v9 = vmax.f32 %v979_v37, 0.0 }
 0x1bd   : > { %v2911_v44 = vpack.c.bf16 %v1046_v40, %v1044_v39 }
 0x1be   : > { %v891_v43 = vpop.f32.mrf.mxu2  ;;  %v716_v47 = vpop.f32.mrf.mxu0 }
 0x1bf   : > { %v892_v12 = vadd.f32 %v891_v43, %v2739_v24  ;;  %v980_v27 = vpop.f32.mrf.mxu3  ;;  %v717_v48 = vadd.f32 %v716_v47, %v2734_v15  ;;  %v805_v49 = vpop.f32.mrf.mxu1 }
 0x1c1   : > { %v981_v51 = vadd.f32 %v980_v27, %v892_v12  ;;  %v806_v52 = vadd.f32 %v805_v49, %v717_v48  ;;  %1325 = vmatmul.bf16.gmra.mxu0 %v2827_v41 }
 0x1c2   : > { %1414 = vmatmul.bf16.gmra.mxu1 %v2835_v54 }
 0x1c3   : > { %v1047_v22 = vmax.f32 %v981_v51, 0.0  ;;  %1503 = vmatmul.bf16.gmra.mxu2 %v2827_v41  ;;  %v1048_v4 = vmax.f32 %v806_v52, 0.0 }
 0x1c4   : > { %1592 = vmatmul.bf16.gmra.mxu3 %v2835_v54 }
 0x1c5   : > { %v2919_v56 = vpack.c.bf16 %v1047_v22, %v1045_v9 }
 0x1c6   : > { %v894_v57 = vpop.f32.mrf.mxu2  ;;  %v718_v61 = vpop.f32.mrf.mxu0 }
 0x1c7   : > { %v895_v58 = vadd.f32 %v894_v57, %v2739_v24  ;;  %v983_v59 = vpop.f32.mrf.mxu3  ;;  %v719_v60 = vadd.f32 %v718_v61, %v2734_v15  ;;  %v807_v8 = vpop.f32.mrf.mxu1 }
 0x1c9   : > { %v984_v1 = vadd.f32 %v983_v59, %v895_v58  ;;  %v808_v2 = vadd.f32 %v807_v8, %v719_v60 }
 0x1cb   : > { %v1050_v41 = vmax.f32 %v808_v2, 0.0  ;;  %v1049_v42 = vmax.f32 %v984_v1, 0.0 }
 0x1cd   : > { %v2928_v0 = vpack.c.bf16 %v1050_v41, %v1048_v4 }
 0x1ce   : > { %v896_v54 = vpop.f32.mrf.mxu2  ;;  %v1291_v11 = vpop.f32.mrf.mxu0 }
 0x1cf   : > { %v897_v7 = vadd.f32 %v896_v54, %v2739_v24  ;;  %v985_v10 = vpop.f32.mrf.mxu3  ;;  %v1380_v13 = vpop.f32.mrf.mxu1  ;;  %v1292_v14 = vadd.f32 %v1291_v11, %v2926_v50  ;;  %v1702_v24 = vld [vmem:[%s3225_s5] sm:$0x3] }
 0x1d0   : > { %v2944_v31 = vperm.slane %v1702_v24, 0 }
 0x1d1   : > { %v986_v15 = vadd.f32 %v985_v10, %v897_v7  ;;  %1330 = vmatmul.bf16.gmra.mxu0 %v2839_v5  ;;  %v1381_v20 = vadd.f32 %v1380_v13, %v1292_v14 }
 0x1d2   : > { %1419 = vmatmul.bf16.gmra.mxu1 %v2847_v17 }
 0x1d3   : > { %v1051_v55 = vmax.f32 %v986_v15, 0.0  ;;  %1508 = vmatmul.bf16.gmra.mxu2 %v2839_v5  ;;  %v1638_v5 = vmax.f32 %v1381_v20, 0.0 }
 0x1d4   : > { %1597 = vmatmul.bf16.gmra.mxu3 %v2847_v17  ;;  %v2947_v17 = vperm.slane %v1702_v24, 1 }
 0x1d5   : > { %v2941_v21 = vpack.c.bf16 %v1051_v55, %v1049_v42  ;;  %v1708_v37 = vmul.f32 %v2944_v31, %v1638_v5 }
 0x1d6   : > { %v1469_v23 = vpop.f32.mrf.mxu2  ;;  %v1293_v45 = vpop.f32.mrf.mxu0 }
 0x1d7   : > { %v1470_v25 = vadd.f32 %v1469_v23, %v2935_v19  ;;  %v1558_v28 = vpop.f32.mrf.mxu3  ;;  %v1382_v30 = vpop.f32.mrf.mxu1  ;;  %v1294_v33 = vadd.f32 %v1293_v45, %v2926_v50 }
 0x1d9   : > { %v1559_v32 = vadd.f32 %v1558_v28, %v1470_v25  ;;  %v1383_v35 = vadd.f32 %v1382_v30, %v1294_v33 }
 0x1db   : > { %v1639_v18 = vmax.f32 %v1559_v32, 0.0  ;;  %v1640_v48 = vmax.f32 %v1383_v35, 0.0 }
 0x1dd   : > { %v1709_v38 = vmul.f32 %v2947_v17, %v1639_v18  ;;  %v1710_v22 = vmul.f32 %v2944_v31, %v1640_v48 }
 0x1de   : > { %v1471_v39 = vpop.f32.mrf.mxu2  ;;  %v1296_v12 = vpop.f32.mrf.mxu0 }
 0x1df   : > { %v1472_v40 = vadd.f32 %v1471_v39, %v2935_v19  ;;  %v1560_v43 = vpop.f32.mrf.mxu3  ;;  %v1772_v27 = vadd.f32 %v1709_v38, %v1708_v37  ;;  %v1385_v47 = vpop.f32.mrf.mxu1  ;;  %v1297_v51 = vadd.f32 %v1296_v12, %v2926_v50 }
 0x1e1   : > { %v1561_v49 = vadd.f32 %v1560_v43, %v1472_v40  ;;  %1773 = vadd.xlane.f32.xlu0 %v1772_v27  ;;  %1335 = vmatmul.bf16.gmra.mxu0 %v2851_v34  ;;  %v1386_v9 = vadd.f32 %v1385_v47, %v1297_v51 }
 0x1e2   : > { %1424 = vmatmul.bf16.gmra.mxu1 %v2859_v46 }
 0x1e3   : > { %v1641_v52 = vmax.f32 %v1561_v49, 0.0  ;;  %1513 = vmatmul.bf16.gmra.mxu2 %v2851_v34  ;;  %v1642_v2 = vmax.f32 %v1386_v9, 0.0 }
 0x1e4   : > { %1602 = vmatmul.bf16.gmra.mxu3 %v2859_v46 }
 0x1e5   : > { %v1711_v57 = vmul.f32 %v2947_v17, %v1641_v52  ;;  %v1712_v46 = vmul.f32 %v2944_v31, %v1642_v2 }
 0x1e6   : > { %v1474_v58 = vpop.f32.mrf.mxu2  ;;  %v1298_v60 = vpop.f32.mrf.mxu0 }
 0x1e7   : > { %v1475_v59 = vadd.f32 %v1474_v58, %v2935_v19  ;;  %v1563_v61 = vpop.f32.mrf.mxu3  ;;  %v1775_v8 = vadd.f32 %v1711_v57, %v1710_v22  ;;  %v1387_v1 = vpop.f32.mrf.mxu1  ;;  %v1299_v4 = vadd.f32 %v1298_v60, %v2926_v50 }
 0x1e9   : > { %v1564_v3 = vadd.f32 %v1563_v61, %v1475_v59  ;;  %1776 = vadd.xlane.f32.xlu0 %v1775_v8  ;;  %v1388_v41 = vadd.f32 %v1387_v1, %v1299_v4 }
 0x1eb   : > { %v1643_v34 = vmax.f32 %v1564_v3, 0.0  ;;  %v1644_v42 = vmax.f32 %v1388_v41, 0.0 }
 0x1ed   : > { %v1713_v54 = vmul.f32 %v2947_v17, %v1643_v34  ;;  %v1714_v25 = vmul.f32 %v2944_v31, %v1644_v42 }
 0x1ee   : > { %v1476_v7 = vpop.f32.mrf.mxu2  ;;  %v1301_v13 = vpop.f32.mrf.mxu0 }
 0x1ef   : > { %v1477_v10 = vadd.f32 %v1476_v7, %v2935_v19  ;;  %v1565_v11 = vpop.f32.mrf.mxu3  ;;  %v1778_v15 = vadd.f32 %v1713_v54, %v1712_v46  ;;  %v1390_v14 = vpop.f32.mrf.mxu1  ;;  %v1302_v20 = vadd.f32 %v1301_v13, %v2926_v50 }
 0x1f1   : > { %v1566_v55 = vadd.f32 %v1565_v11, %v1477_v10  ;;  %1779 = vadd.xlane.f32.xlu1 %v1778_v15  ;;  %1340 = vmatmul.bf16.gmra.mxu0 %v2863_v62  ;;  %v1391_v23 = vadd.f32 %v1390_v14, %v1302_v20 }
 0x1f2   : > { %1429 = vmatmul.bf16.gmra.mxu1 %v2871_v6 }
 0x1f3   : > { %v1645_v24 = vmax.f32 %v1566_v55, 0.0  ;;  %1518 = vmatmul.bf16.gmra.mxu2 %v2863_v62  ;;  %v1646_v35 = vmax.f32 %v1391_v23, 0.0 }
 0x1f4   : > { %1607 = vmatmul.bf16.gmra.mxu3 %v2871_v6 }
 0x1f5   : > { %v1715_v28 = vmul.f32 %v2947_v17, %v1645_v24  ;;  %v1716_v6 = vmul.f32 %v2944_v31, %v1646_v35 }
 0x1f6   : > { %v1479_v45 = vpop.f32.mrf.mxu2  ;;  %v1303_v32 = vpop.f32.mrf.mxu0 }
 0x1f7   : > { %v1480_v30 = vadd.f32 %v1479_v45, %v2935_v19  ;;  %v1568_v5 = vpop.f32.mrf.mxu3  ;;  %v1781_v33 = vadd.f32 %v1715_v28, %v1714_v25  ;;  %v1392_v18 = vpop.f32.mrf.mxu1  ;;  %v1304_v38 = vadd.f32 %v1303_v32, %v2926_v50 }
 0x1f9   : > { %v1569_v37 = vadd.f32 %v1568_v5, %v1480_v30  ;;  %1782 = vadd.xlane.f32.xlu1 %v1781_v33  ;;  %v1393_v39 = vadd.f32 %v1392_v18, %v1304_v38 }
 0x1fb   : > { %v1647_v62 = vmax.f32 %v1569_v37, 0.0  ;;  %v1648_v51 = vmax.f32 %v1393_v39, 0.0 }
 0x1fd   : > { %v1717_v40 = vmul.f32 %v2947_v17, %v1647_v62  ;;  %v1718_v58 = vmul.f32 %v2944_v31, %v1648_v51 }
 0x1fe   : > { %v1481_v43 = vpop.f32.mrf.mxu2  ;;  %v1306_v47 = vpop.f32.mrf.mxu0 }
 0x1ff   : > { %v1482_v12 = vadd.f32 %v1481_v43, %v2935_v19  ;;  %v1570_v27 = vpop.f32.mrf.mxu3  ;;  %v1784_v48 = vadd.f32 %v1717_v40, %v1716_v6  ;;  %v1395_v49 = vpop.f32.mrf.mxu1  ;;  %v1307_v9 = vadd.f32 %v1306_v47, %v2926_v50 }
 0x201   : > { %v1571_v52 = vadd.f32 %v1570_v27, %v1482_v12  ;;  %1785 = vadd.xlane.f32.xlu2 %v1784_v48  ;;  %1345 = vmatmul.bf16.gmra.mxu0 %v2875_v26  ;;  %v1396_v57 = vadd.f32 %v1395_v49, %v1307_v9 }
 0x202   : > { %1434 = vmatmul.bf16.gmra.mxu1 %v2883_v36 }
 0x203   : > { %v1649_v22 = vmax.f32 %v1571_v52, 0.0  ;;  %1523 = vmatmul.bf16.gmra.mxu2 %v2875_v26  ;;  %v1650_v4 = vmax.f32 %v1396_v57, 0.0 }
 0x204   : > { %1612 = vmatmul.bf16.gmra.mxu3 %v2883_v36 }
 0x205   : > { %v1719_v59 = vmul.f32 %v2947_v17, %v1649_v22  ;;  %v1720_v36 = vmul.f32 %v2944_v31, %v1650_v4 }
 0x206   : > { %v1484_v61 = vpop.f32.mrf.mxu2  ;;  %v1308_v1 = vpop.f32.mrf.mxu0 }
 0x207   : > { %v1485_v60 = vadd.f32 %v1484_v61, %v2935_v19  ;;  %v1573_v8 = vpop.f32.mrf.mxu3  ;;  %v1787_v2 = vadd.f32 %v1719_v59, %v1718_v58  ;;  %v1397_v3 = vpop.f32.mrf.mxu1  ;;  %v1309_v41 = vadd.f32 %v1308_v1, %v2926_v50 }
 0x209   : > { %v1574_v34 = vadd.f32 %v1573_v8, %v1485_v60  ;;  %1788 = vadd.xlane.f32.xlu2 %v1787_v2  ;;  %v1398_v54 = vadd.f32 %v1397_v3, %v1309_v41 }
 0x20b   : > { %v1651_v26 = vmax.f32 %v1574_v34, 0.0  ;;  %v1652_v42 = vmax.f32 %v1398_v54, 0.0 }
 0x20d   : > { %v1721_v46 = vmul.f32 %v2947_v17, %v1651_v26  ;;  %v1722_v25 = vmul.f32 %v2944_v31, %v1652_v42 }
 0x20e   : > { %v1486_v7 = vpop.f32.mrf.mxu2  ;;  %v1311_v13 = vpop.f32.mrf.mxu0 }
 0x20f   : > { %v1487_v10 = vadd.f32 %v1486_v7, %v2935_v19  ;;  %v1575_v11 = vpop.f32.mrf.mxu3  ;;  %v1790_v15 = vadd.f32 %v1721_v46, %v1720_v36  ;;  %v1400_v14 = vpop.f32.mrf.mxu1  ;;  %v1312_v20 = vadd.f32 %v1311_v13, %v2926_v50 }
 0x211   : > { %v1576_v55 = vadd.f32 %v1575_v11, %v1487_v10  ;;  %1791 = vadd.xlane.f32.xlu0 %v1790_v15  ;;  %1350 = vmatmul.bf16.gmra.mxu0 %v2887_v53  ;;  %v1401_v23 = vadd.f32 %v1400_v14, %v1312_v20 }
 0x212   : > { %1439 = vmatmul.bf16.gmra.mxu1 %v2895_v63 }
 0x213   : > { %v1653_v24 = vmax.f32 %v1576_v55, 0.0  ;;  %1528 = vmatmul.bf16.gmra.mxu2 %v2887_v53  ;;  %v1654_v35 = vmax.f32 %v1401_v23, 0.0 }
 0x214   : > { %1617 = vmatmul.bf16.gmra.mxu3 %v2895_v63 }
 0x215   : > { %v1723_v28 = vmul.f32 %v2947_v17, %v1653_v24  ;;  %v1724_v63 = vmul.f32 %v2944_v31, %v1654_v35 }
 0x216   : > { %v1489_v45 = vpop.f32.mrf.mxu2  ;;  %v1313_v32 = vpop.f32.mrf.mxu0 }
 0x217   : > { %v1490_v30 = vadd.f32 %v1489_v45, %v2935_v19  ;;  %v1578_v5 = vpop.f32.mrf.mxu3  ;;  %v1793_v33 = vadd.f32 %v1723_v28, %v1722_v25  ;;  %v1402_v18 = vpop.f32.mrf.mxu1  ;;  %v1314_v38 = vadd.f32 %v1313_v32, %v2926_v50 }
 0x219   : > { %v1579_v37 = vadd.f32 %v1578_v5, %v1490_v30  ;;  %1794 = vadd.xlane.f32.xlu1 %v1793_v33  ;;  %v1403_v39 = vadd.f32 %v1402_v18, %v1314_v38 }
 0x21b   : > { %v1655_v53 = vmax.f32 %v1579_v37, 0.0  ;;  %v1656_v48 = vmax.f32 %v1403_v39, 0.0 }
 0x21d   : > { %v1725_v62 = vmul.f32 %v2947_v17, %v1655_v53  ;;  %v1726_v9 = vmul.f32 %v2944_v31, %v1656_v48 }
 0x21e   : > { %v1491_v6 = vpop.f32.mrf.mxu2  ;;  %v1316_v12 = vpop.f32.mrf.mxu0 }
 0x21f   : > { %v1492_v40 = vadd.f32 %v1491_v6, %v2935_v19  ;;  %v1580_v43 = vpop.f32.mrf.mxu3  ;;  %v1796_v27 = vadd.f32 %v1725_v62, %v1724_v63  ;;  %v1405_v47 = vpop.f32.mrf.mxu1  ;;  %v1317_v51 = vadd.f32 %v1316_v12, %v2926_v50 }
 0x221   : > { %v1581_v49 = vadd.f32 %v1580_v43, %v1492_v40  ;;  %1797 = vadd.xlane.f32.xlu2 %v1796_v27  ;;  %1355 = vmatmul.bf16.gmra.mxu0 %v2899_v16  ;;  %v1406_v57 = vadd.f32 %v1405_v47, %v1317_v51 }
 0x222   : > { %1444 = vmatmul.bf16.gmra.mxu1 %v2907_v29 }
 0x223   : > { %v1657_v52 = vmax.f32 %v1581_v49, 0.0  ;;  %1533 = vmatmul.bf16.gmra.mxu2 %v2899_v16  ;;  %v1658_v2 = vmax.f32 %v1406_v57, 0.0 }
 0x224   : > { %1622 = vmatmul.bf16.gmra.mxu3 %v2907_v29 }
 0x225   : > { %v1727_v22 = vmul.f32 %v2947_v17, %v1657_v52  ;;  %v1728_v29 = vmul.f32 %v2944_v31, %v1658_v2 }
 0x226   : > { %v1494_v58 = vpop.f32.mrf.mxu2  ;;  %v1318_v60 = vpop.f32.mrf.mxu0 }
 0x227   : > { %v1495_v59 = vadd.f32 %v1494_v58, %v2935_v19  ;;  %v1583_v61 = vpop.f32.mrf.mxu3  ;;  %v1799_v8 = vadd.f32 %v1727_v22, %v1726_v9  ;;  %v1407_v1 = vpop.f32.mrf.mxu1  ;;  %v1319_v4 = vadd.f32 %v1318_v60, %v2926_v50 }
 0x229   : > { %v1584_v3 = vadd.f32 %v1583_v61, %v1495_v59  ;;  %1800 = vadd.xlane.f32.xlu0 %v1799_v8  ;;  %v1408_v41 = vadd.f32 %v1407_v1, %v1319_v4 }
 0x22b   : > { %v1659_v16 = vmax.f32 %v1584_v3, 0.0  ;;  %v1660_v11 = vmax.f32 %v1408_v41, 0.0 }
 0x22d   : > { %v1729_v34 = vmul.f32 %v2947_v17, %v1659_v16  ;;  %v1730_v42 = vmul.f32 %v2944_v31, %v1660_v11 }
 0x22e   : > { %v1496_v26 = vpop.f32.mrf.mxu2  ;;  %v1321_v54 = vpop.f32.mrf.mxu0 }
 0x22f   : > { %v1497_v36 = vadd.f32 %v1496_v26, %v2935_v19  ;;  %v1585_v46 = vpop.f32.mrf.mxu3  ;;  %v1802_v7 = vadd.f32 %v1729_v34, %v1728_v29  ;;  %v1410_v10 = vpop.f32.mrf.mxu1  ;;  %v1322_v15 = vadd.f32 %v1321_v54, %v2926_v50 }
 0x231   : > { %v1586_v13 = vadd.f32 %v1585_v46, %v1497_v36  ;;  %1803 = vadd.xlane.f32.xlu1 %v1802_v7  ;;  %1360 = vmatmul.bf16.gmra.mxu0 %v2911_v44  ;;  %v1411_v20 = vadd.f32 %v1410_v10, %v1322_v15  ;;  %v3039_v36 = vstv %s1868_s20 }
 0x232   : > { %1449 = vmatmul.bf16.gmra.mxu1 %v2919_v56 }
 0x233   : > { %v1661_v14 = vmax.f32 %v1586_v13, 0.0  ;;  %1538 = vmatmul.bf16.gmra.mxu2 %v2911_v44  ;;  %v1662_v5 = vmax.f32 %v1411_v20, 0.0 }
 0x234   : > { %1627 = vmatmul.bf16.gmra.mxu3 %v2919_v56 }
 0x235   : > { %v1731_v55 = vmul.f32 %v2947_v17, %v1661_v14  ;;  %v1732_v56 = vmul.f32 %v2944_v31, %v1662_v5 }
 0x236   : > { %v1499_v24 = vpop.f32.mrf.mxu2  ;;  %v1323_v28 = vpop.f32.mrf.mxu0 }
 0x237   : > { %v1500_v23 = vadd.f32 %v1499_v24, %v2935_v19  ;;  %v1588_v25 = vpop.f32.mrf.mxu3  ;;  %v1805_v45 = vadd.f32 %v1731_v55, %v1730_v42  ;;  %v1412_v30 = vpop.f32.mrf.mxu1  ;;  %v1324_v33 = vadd.f32 %v1323_v28, %v2926_v50 }
 0x239   : > { %v1589_v32 = vadd.f32 %v1588_v25, %v1500_v23  ;;  %1806 = vadd.xlane.f32.xlu2 %v1805_v45  ;;  %v1413_v35 = vadd.f32 %v1412_v30, %v1324_v33 }
 0x23b   : > { %v1663_v44 = vmax.f32 %v1589_v32, 0.0  ;;  %v1664_v6 = vmax.f32 %v1413_v35, 0.0 }
 0x23d   : > { %v1733_v18 = vmul.f32 %v2947_v17, %v1663_v44  ;;  %v1734_v27 = vmul.f32 %v2944_v31, %v1664_v6 }
 0x23e   : > { %v1501_v37 = vpop.f32.mrf.mxu2  ;;  %v1326_v63 = vpop.f32.mrf.mxu0 }
 0x23f   : > { %v1502_v38 = vadd.f32 %v1501_v37, %v2935_v19  ;;  %v1590_v53 = vpop.f32.mrf.mxu3  ;;  %v1808_v62 = vadd.f32 %v1733_v18, %v1732_v56  ;;  %v1415_v39 = vpop.f32.mrf.mxu1  ;;  %v1327_v43 = vadd.f32 %v1326_v63, %v2926_v50 }
 0x241   : > { %v1591_v40 = vadd.f32 %v1590_v53, %v1502_v38  ;;  %1809 = vadd.xlane.f32.xlu0 %v1808_v62  ;;  %1365 = vmatmul.bf16.gmra.mxu0 %v2928_v0  ;;  %v1416_v48 = vadd.f32 %v1415_v39, %v1327_v43 }
 0x242   : > { %1454 = vmatmul.bf16.gmra.mxu1 %v2941_v21 }
 0x243   : > { %v1665_v12 = vmax.f32 %v1591_v40, 0.0  ;;  %1543 = vmatmul.bf16.gmra.mxu2 %v2928_v0  ;;  %v1666_v58 = vmax.f32 %v1416_v48, 0.0 }
 0x244   : > { %1632 = vmatmul.bf16.gmra.mxu3 %v2941_v21 }
 0x245   : > { %v1735_v47 = vmul.f32 %v2947_v17, %v1665_v12  ;;  %v1736_v61 = vmul.f32 %v2944_v31, %v1666_v58 }
 0x246   : > { %v1504_v49 = vpop.f32.mrf.mxu2  ;;  %v1328_v9 = vpop.f32.mrf.mxu0 }
 0x247   : > { %v1505_v51 = vadd.f32 %v1504_v49, %v2935_v19  ;;  %v1593_v52 = vpop.f32.mrf.mxu3  ;;  %v1811_v22 = vadd.f32 %v1735_v47, %v1734_v27  ;;  %v1417_v57 = vpop.f32.mrf.mxu1  ;;  %v1329_v0 = vadd.f32 %v1328_v9, %v2926_v50 }
 0x249   : > { %v1594_v59 = vadd.f32 %v1593_v52, %v1505_v51  ;;  %1812 = vadd.xlane.f32.xlu1 %v1811_v22  ;;  %v1418_v8 = vadd.f32 %v1417_v57, %v1329_v0 }
 0x24b   : > { %v1667_v21 = vmax.f32 %v1594_v59, 0.0  ;;  %v1668_v34 = vmax.f32 %v1418_v8, 0.0 }
 0x24d   : > { %v1737_v60 = vmul.f32 %v2947_v17, %v1667_v21  ;;  %v1738_v7 = vmul.f32 %v2944_v31, %v1668_v34 }
 0x24e   : > { %v1506_v1 = vpop.f32.mrf.mxu2  ;;  %v1331_v4 = vpop.f32.mrf.mxu0 }
 0x24f   : > { %v1507_v2 = vadd.f32 %v1506_v1, %v2935_v19  ;;  %v1595_v3 = vpop.f32.mrf.mxu3  ;;  %v1814_v16 = vadd.f32 %v1737_v60, %v1736_v61  ;;  %v1420_v29 = vpop.f32.mrf.mxu1  ;;  %v1332_v26 = vadd.f32 %v1331_v4, %v2926_v50 }
 0x251   : > { %v1596_v41 = vadd.f32 %v1595_v3, %v1507_v2  ;;  %1815 = vadd.xlane.f32.xlu2 %v1814_v16  ;;  %v1421_v11 = vadd.f32 %v1420_v29, %v1332_v26 }
 0x253   : > { %v1669_v46 = vmax.f32 %v1596_v41, 0.0  ;;  %v1670_v23 = vmax.f32 %v1421_v11, 0.0 }
 0x254   : > { %v1774_v54 = vpop.xlane.xlu0 %1773 }
 0x255   : > { %v1739_v10 = vmul.f32 %v2947_v17, %v1669_v46  ;;  %v1870_v13 = vadd.f32 %v3039_v36, %v1774_v54  ;;  %v1740_v5 = vmul.f32 %v2944_v31, %v1670_v23 }
 0x256   : > { %v1509_v15 = vpop.f32.mrf.mxu2  ;;  %v1333_v55 = vpop.f32.mrf.mxu0 }
 0x257   : > { %1903 = vst.msk [vmem:[%s3044_s9] sm:$0xff] %vm1902_vm0, %v1870_v13  ;;  %v1510_v14 = vadd.f32 %v1509_v15, %v2935_v19  ;;  %v1598_v42 = vpop.f32.mrf.mxu3  ;;  %v1817_v20 = vadd.f32 %v1739_v10, %v1738_v7  ;;  %v1422_v24 = vpop.f32.mrf.mxu1  ;;  %v1334_v28 = vadd.f32 %v1333_v55, %v2926_v50 }
 0x259   : > { %v1599_v25 = vadd.f32 %v1598_v42, %v1510_v14  ;;  %1818 = vadd.xlane.f32.xlu0 %v1817_v20  ;;  %v1423_v33 = vadd.f32 %v1422_v24, %v1334_v28 }
 0x25b   : > { %v1671_v45 = vmax.f32 %v1599_v25, 0.0  ;;  %v1672_v63 = vmax.f32 %v1423_v33, 0.0 }
 0x25c   : > { %v1777_v30 = vpop.xlane.xlu0 %1776 }
 0x25d   : > { %v1741_v32 = vmul.f32 %v2947_v17, %v1671_v45  ;;  %v1871_v44 = vadd.f32 %v3039_v36, %v1777_v30  ;;  %v1742_v43 = vmul.f32 %v2944_v31, %v1672_v63 }
 0x25e   : > { %v1511_v56 = vpop.f32.mrf.mxu2  ;;  %v1336_v37 = vpop.f32.mrf.mxu0 }
 0x25f   : > { %1904 = vst.msk [vmem:[%s3044_s9 + $0x8] sm:$0xff] %vm1902_vm0, %v1871_v44  ;;  %v1512_v18 = vadd.f32 %v1511_v56, %v2935_v19  ;;  %v1600_v35 = vpop.f32.mrf.mxu3  ;;  %v1820_v38 = vadd.f32 %v1741_v32, %v1740_v5  ;;  %v1425_v53 = vpop.f32.mrf.mxu1  ;;  %v1337_v39 = vadd.f32 %v1336_v37, %v2926_v50 }
 0x261   : > { %v1601_v62 = vadd.f32 %v1600_v35, %v1512_v18  ;;  %1821 = vadd.xlane.f32.xlu1 %v1820_v38  ;;  %v1426_v27 = vadd.f32 %v1425_v53, %v1337_v39 }
 0x263   : > { %v1673_v6 = vmax.f32 %v1601_v62, 0.0  ;;  %v1674_v57 = vmax.f32 %v1426_v27, 0.0 }
 0x264   : > { %v1780_v40 = vpop.xlane.xlu1 %1779 }
 0x265   : > { %v1743_v12 = vmul.f32 %v2947_v17, %v1673_v6  ;;  %v1872_v47 = vadd.f32 %v3039_v36, %v1780_v40  ;;  %v1744_v61 = vmul.f32 %v2944_v31, %v1674_v57 }
 0x266   : > { %v1514_v48 = vpop.f32.mrf.mxu2  ;;  %v1338_v52 = vpop.f32.mrf.mxu0 }
 0x267   : > { %1905 = vst.msk [vmem:[%s3044_s9 + $0x10] sm:$0xff] %vm1902_vm0, %v1872_v47  ;;  %v1515_v49 = vadd.f32 %v1514_v48, %v2935_v19  ;;  %v1603_v51 = vpop.f32.mrf.mxu3  ;;  %v1823_v9 = vadd.f32 %v1743_v12, %v1742_v43  ;;  %v1427_v22 = vpop.f32.mrf.mxu1  ;;  %v1339_v59 = vadd.f32 %v1338_v52, %v2926_v50 }
 0x269   : > { %v1604_v58 = vadd.f32 %v1603_v51, %v1515_v49  ;;  %1824 = vadd.xlane.f32.xlu2 %v1823_v9  ;;  %v1428_v8 = vadd.f32 %v1427_v22, %v1339_v59 }
 0x26b   : > { %v1675_v0 = vmax.f32 %v1604_v58, 0.0  ;;  %v1676_v41 = vmax.f32 %v1428_v8, 0.0 }
 0x26c   : > { %v1783_v21 = vpop.xlane.xlu1 %1782 }
 0x26d   : > { %v1745_v60 = vmul.f32 %v2947_v17, %v1675_v0  ;;  %v1873_v1 = vadd.f32 %v3039_v36, %v1783_v21  ;;  %v1746_v10 = vmul.f32 %v2944_v31, %v1676_v41 }
 0x26e   : > { %v1516_v2 = vpop.f32.mrf.mxu2  ;;  %v1341_v16 = vpop.f32.mrf.mxu0 }
 0x26f   : > { %1906 = vst.msk [vmem:[%s3044_s9 + $0x18] sm:$0xff] %vm1902_vm0, %v1873_v1  ;;  %v1517_v3 = vadd.f32 %v1516_v2, %v2935_v19  ;;  %v1605_v4 = vpop.f32.mrf.mxu3  ;;  %v1826_v29 = vadd.f32 %v1745_v60, %v1744_v61  ;;  %v1430_v34 = vpop.f32.mrf.mxu1  ;;  %v1342_v46 = vadd.f32 %v1341_v16, %v2926_v50 }
 0x271   : > { %v1606_v26 = vadd.f32 %v1605_v4, %v1517_v3  ;;  %1827 = vadd.xlane.f32.xlu0 %v1826_v29  ;;  %v1431_v13 = vadd.f32 %v1430_v34, %v1342_v46 }
 0x273   : > { %v1677_v54 = vmax.f32 %v1606_v26, 0.0  ;;  %v1678_v25 = vmax.f32 %v1431_v13, 0.0 }
 0x274   : > { %v1786_v7 = vpop.xlane.xlu2 %1785 }
 0x275   : > { %v1747_v11 = vmul.f32 %v2947_v17, %v1677_v54  ;;  %v1874_v15 = vadd.f32 %v3039_v36, %v1786_v7  ;;  %v1748_v32 = vmul.f32 %v2944_v31, %v1678_v25 }
 0x276   : > { %v1519_v14 = vpop.f32.mrf.mxu2  ;;  %v1343_v20 = vpop.f32.mrf.mxu0 }
 0x277   : > { %1907 = vst.msk [vmem:[%s3044_s9 + $0x20] sm:$0xff] %vm1902_vm0, %v1874_v15  ;;  %v1520_v42 = vadd.f32 %v1519_v14, %v2935_v19  ;;  %v1608_v55 = vpop.f32.mrf.mxu3  ;;  %v1829_v24 = vadd.f32 %v1747_v11, %v1746_v10  ;;  %v1432_v23 = vpop.f32.mrf.mxu1  ;;  %v1344_v45 = vadd.f32 %v1343_v20, %v2926_v50 }
 0x279   : > { %v1609_v28 = vadd.f32 %v1608_v55, %v1520_v42  ;;  %1830 = vadd.xlane.f32.xlu1 %v1829_v24  ;;  %v1433_v44 = vadd.f32 %v1432_v23, %v1344_v45 }
 0x27b   : > { %v1679_v30 = vmax.f32 %v1609_v28, 0.0  ;;  %v1680_v62 = vmax.f32 %v1433_v44, 0.0 }
 0x27c   : > { %v1789_v5 = vpop.xlane.xlu2 %1788 }
 0x27d   : > { %v1749_v33 = vmul.f32 %v2947_v17, %v1679_v30  ;;  %v1875_v56 = vadd.f32 %v3039_v36, %v1789_v5  ;;  %v1750_v12 = vmul.f32 %v2944_v31, %v1680_v62 }
 0x27e   : > { %v1521_v18 = vpop.f32.mrf.mxu2  ;;  %v1346_v38 = vpop.f32.mrf.mxu0 }
 0x27f   : > { %1908 = vst.msk [vmem:[%s3044_s9 + $0x28] sm:$0xff] %vm1902_vm0, %v1875_v56  ;;  %v1522_v35 = vadd.f32 %v1521_v18, %v2935_v19  ;;  %v1610_v37 = vpop.f32.mrf.mxu3  ;;  %v1832_v53 = vadd.f32 %v1749_v33, %v1748_v32  ;;  %v1435_v63 = vpop.f32.mrf.mxu1  ;;  %v1347_v6 = vadd.f32 %v1346_v38, %v2926_v50 }
 0x281   : > { %v1611_v39 = vadd.f32 %v1610_v37, %v1522_v35  ;;  %1833 = vadd.xlane.f32.xlu2 %v1832_v53  ;;  %v1436_v47 = vadd.f32 %v1435_v63, %v1347_v6 }
 0x283   : > { %v1681_v40 = vmax.f32 %v1611_v39, 0.0  ;;  %v1682_v58 = vmax.f32 %v1436_v47, 0.0 }
 0x284   : > { %v1792_v43 = vpop.xlane.xlu0 %1791 }
 0x285   : > { %v1751_v27 = vmul.f32 %v2947_v17, %v1681_v40  ;;  %v1876_v48 = vadd.f32 %v3039_v36, %v1792_v43  ;;  %v1752_v60 = vmul.f32 %v2944_v31, %v1682_v58 }
 0x286   : > { %v1524_v49 = vpop.f32.mrf.mxu2  ;;  %v1348_v9 = vpop.f32.mrf.mxu0 }
 0x287   : > { %1909 = vst.msk [vmem:[%s3044_s9 + $0x30] sm:$0xff] %vm1902_vm0, %v1876_v48  ;;  %v1525_v51 = vadd.f32 %v1524_v49, %v2935_v19  ;;  %v1613_v52 = vpop.f32.mrf.mxu3  ;;  %v1835_v22 = vadd.f32 %v1751_v27, %v1750_v12  ;;  %v1437_v57 = vpop.f32.mrf.mxu1  ;;  %v1349_v0 = vadd.f32 %v1348_v9, %v2926_v50 }
 0x289   : > { %v1614_v59 = vadd.f32 %v1613_v52, %v1525_v51  ;;  %1836 = vadd.xlane.f32.xlu0 %v1835_v22  ;;  %v1438_v1 = vadd.f32 %v1437_v57, %v1349_v0 }
 0x28b   : > { %v1683_v21 = vmax.f32 %v1614_v59, 0.0  ;;  %v1684_v26 = vmax.f32 %v1438_v1, 0.0 }
 0x28c   : > { %v1795_v61 = vpop.xlane.xlu1 %1794 }
 0x28d   : > { %v1753_v8 = vmul.f32 %v2947_v17, %v1683_v21  ;;  %v1877_v2 = vadd.f32 %v3039_v36, %v1795_v61  ;;  %v1754_v11 = vmul.f32 %v2944_v31, %v1684_v26 }
 0x28e   : > { %v1526_v3 = vpop.f32.mrf.mxu2  ;;  %v1351_v29 = vpop.f32.mrf.mxu0 }
 0x28f   : > { %1910 = vst.msk [vmem:[%s3044_s9 + $0x38] sm:$0xff] %vm1902_vm0, %v1877_v2  ;;  %v1527_v4 = vadd.f32 %v1526_v3, %v2935_v19  ;;  %v1615_v16 = vpop.f32.mrf.mxu3  ;;  %v1838_v34 = vadd.f32 %v1753_v8, %v1752_v60  ;;  %v1440_v41 = vpop.f32.mrf.mxu1  ;;  %v1352_v54 = vadd.f32 %v1351_v29, %v2926_v50 }
 0x291   : > { %v1616_v46 = vadd.f32 %v1615_v16, %v1527_v4  ;;  %1839 = vadd.xlane.f32.xlu1 %v1838_v34  ;;  %v1441_v15 = vadd.f32 %v1440_v41, %v1352_v54 }
 0x293   : > { %v1685_v7 = vmax.f32 %v1616_v46, 0.0  ;;  %v1686_v28 = vmax.f32 %v1441_v15, 0.0 }
 0x294   : > { %v1798_v10 = vpop.xlane.xlu2 %1797 }
 0x295   : > { %v1755_v13 = vmul.f32 %v2947_v17, %v1685_v7  ;;  %v1878_v14 = vadd.f32 %v3039_v36, %v1798_v10  ;;  %v1756_v33 = vmul.f32 %v2944_v31, %v1686_v28 }
 0x296   : > { %v1529_v42 = vpop.f32.mrf.mxu2  ;;  %v1353_v24 = vpop.f32.mrf.mxu0 }
 0x297   : > { %1911 = vst.msk [vmem:[%s3044_s9 + $0x40] sm:$0xff] %vm1902_vm0, %v1878_v14  ;;  %v1530_v55 = vadd.f32 %v1529_v42, %v2935_v19  ;;  %v1618_v20 = vpop.f32.mrf.mxu3  ;;  %v1841_v23 = vadd.f32 %v1755_v13, %v1754_v11  ;;  %v1442_v25 = vpop.f32.mrf.mxu1  ;;  %v1354_v30 = vadd.f32 %v1353_v24, %v2926_v50 }
 0x299   : > { %v1619_v45 = vadd.f32 %v1618_v20, %v1530_v55  ;;  %1842 = vadd.xlane.f32.xlu2 %v1841_v23  ;;  %v1443_v56 = vadd.f32 %v1442_v25, %v1354_v30 }
 0x29b   : > { %v1687_v5 = vmax.f32 %v1619_v45, 0.0  ;;  %v1688_v39 = vmax.f32 %v1443_v56, 0.0 }
 0x29c   : > { %v1801_v32 = vpop.xlane.xlu0 %1800 }
 0x29d   : > { %v1757_v44 = vmul.f32 %v2947_v17, %v1687_v5  ;;  %v1879_v18 = vadd.f32 %v3039_v36, %v1801_v32  ;;  %v1758_v27 = vmul.f32 %v2944_v31, %v1688_v39 }
 0x29e   : > { %v1531_v35 = vpop.f32.mrf.mxu2  ;;  %v1356_v53 = vpop.f32.mrf.mxu0 }
 0x29f   : > { %1912 = vst.msk [vmem:[%s3044_s9 + $0x48] sm:$0xff] %vm1902_vm0, %v1879_v18  ;;  %v1532_v37 = vadd.f32 %v1531_v35, %v2935_v19  ;;  %v1620_v38 = vpop.f32.mrf.mxu3  ;;  %v1844_v63 = vadd.f32 %v1757_v44, %v1756_v33  ;;  %v1445_v62 = vpop.f32.mrf.mxu1  ;;  %v1357_v40 = vadd.f32 %v1356_v53, %v2926_v50 }
 0x2a1   : > { %v1621_v6 = vadd.f32 %v1620_v38, %v1532_v37  ;;  %1845 = vadd.xlane.f32.xlu0 %v1844_v63  ;;  %v1446_v48 = vadd.f32 %v1445_v62, %v1357_v40 }
 0x2a3   : > { %v1689_v43 = vmax.f32 %v1621_v6, 0.0  ;;  %v1690_v59 = vmax.f32 %v1446_v48, 0.0 }
 0x2a4   : > { %v1804_v12 = vpop.xlane.xlu1 %1803 }
 0x2a5   : > { %v1759_v47 = vmul.f32 %v2947_v17, %v1689_v43  ;;  %v1880_v49 = vadd.f32 %v3039_v36, %v1804_v12  ;;  %v1760_v8 = vmul.f32 %v2944_v31, %v1690_v59 }
 0x2a6   : > { %v1534_v51 = vpop.f32.mrf.mxu2  ;;  %v1358_v22 = vpop.f32.mrf.mxu0 }
 0x2a7   : > { %1913 = vst.msk [vmem:[%s3044_s9 + $0x50] sm:$0xff] %vm1902_vm0, %v1880_v49  ;;  %v1535_v52 = vadd.f32 %v1534_v51, %v2935_v19  ;;  %v1623_v9 = vpop.f32.mrf.mxu3  ;;  %v1847_v57 = vadd.f32 %v1759_v47, %v1758_v27  ;;  %v1447_v58 = vpop.f32.mrf.mxu1  ;;  %v1359_v21 = vadd.f32 %v1358_v22, %v2926_v50 }
 0x2a9   : > { %v1624_v0 = vadd.f32 %v1623_v9, %v1535_v52  ;;  %1848 = vadd.xlane.f32.xlu1 %v1847_v57  ;;  %v1448_v2 = vadd.f32 %v1447_v58, %v1359_v21 }
 0x2ab   : > { %v1691_v61 = vmax.f32 %v1624_v0, 0.0  ;;  %v1692_v46 = vmax.f32 %v1448_v2, 0.0 }
 0x2ac   : > { %v1807_v60 = vpop.xlane.xlu2 %1806 }
 0x2ad   : > { %v1761_v1 = vmul.f32 %v2947_v17, %v1691_v61  ;;  %v1881_v3 = vadd.f32 %v3039_v36, %v1807_v60  ;;  %v1762_v13 = vmul.f32 %v2944_v31, %v1692_v46 }
 0x2ae   : > { %v1536_v4 = vpop.f32.mrf.mxu2  ;;  %v1361_v34 = vpop.f32.mrf.mxu0 }
 0x2af   : > { %1914 = vst.msk [vmem:[%s3044_s9 + $0x58] sm:$0xff] %vm1902_vm0, %v1881_v3  ;;  %v1537_v16 = vadd.f32 %v1536_v4, %v2935_v19  ;;  %v1625_v29 = vpop.f32.mrf.mxu3  ;;  %v1850_v41 = vadd.f32 %v1761_v1, %v1760_v8  ;;  %v1450_v26 = vpop.f32.mrf.mxu1  ;;  %v1362_v7 = vadd.f32 %v1361_v34, %v2926_v50 }
 0x2b1   : > { %v1626_v54 = vadd.f32 %v1625_v29, %v1537_v16  ;;  %1851 = vadd.xlane.f32.xlu2 %v1850_v41  ;;  %v1451_v14 = vadd.f32 %v1450_v26, %v1362_v7 }
 0x2b3   : > { %v1693_v10 = vmax.f32 %v1626_v54, 0.0  ;;  %v1694_v45 = vmax.f32 %v1451_v14, 0.0 }
 0x2b4   : > { %v1810_v11 = vpop.xlane.xlu0 %1809 }
 0x2b5   : > { %v1763_v15 = vmul.f32 %v2947_v17, %v1693_v10  ;;  %v1882_v42 = vadd.f32 %v3039_v36, %v1810_v11  ;;  %v1764_v44 = vmul.f32 %v2944_v31, %v1694_v45 }
 0x2b6   : > { %v1539_v55 = vpop.f32.mrf.mxu2  ;;  %v1363_v23 = vpop.f32.mrf.mxu0 }
 0x2b7   : > { %1915 = vst.msk [vmem:[%s3044_s9 + $0x60] sm:$0xff] %vm1902_vm0, %v1882_v42  ;;  %v1540_v20 = vadd.f32 %v1539_v55, %v2935_v19  ;;  %v1628_v24 = vpop.f32.mrf.mxu3  ;;  %v1853_v25 = vadd.f32 %v1763_v15, %v1762_v13  ;;  %v1452_v28 = vpop.f32.mrf.mxu1  ;;  %v1364_v5 = vadd.f32 %v1363_v23, %v2926_v50 }
 0x2b9   : > { %v1629_v30 = vadd.f32 %v1628_v24, %v1540_v20  ;;  %1854 = vadd.xlane.f32.xlu0 %v1853_v25  ;;  %v1453_v18 = vadd.f32 %v1452_v28, %v1364_v5 }
 0x2bb   : > { %v1695_v32 = vmax.f32 %v1629_v30, 0.0  ;;  %v1696_v39 = vmax.f32 %v1453_v18, 0.0 }
 0x2bc   : > { %v1813_v33 = vpop.xlane.xlu1 %1812 }
 0x2bd   : > { %v1765_v56 = vmul.f32 %v2947_v17, %v1695_v32  ;;  %v1883_v35 = vadd.f32 %v3039_v36, %v1813_v33  ;;  %v1766_v47 = vmul.f32 %v2944_v31, %v1696_v39 }
 0x2be   : > { %v1541_v37 = vpop.f32.mrf.mxu2  ;;  %v1366_v63 = vpop.f32.mrf.mxu0 }
 0x2bf   : > { %1916 = vst.msk [vmem:[%s3044_s9 + $0x68] sm:$0xff] %vm1902_vm0, %v1883_v35  ;;  %v1542_v38 = vadd.f32 %v1541_v37, %v2935_v19  ;;  %v1630_v53 = vpop.f32.mrf.mxu3  ;;  %v1856_v62 = vadd.f32 %v1765_v56, %v1764_v44  ;;  %v1367_v40 = vadd.f32 %v1366_v63, %v2926_v50  ;;  %v1455_v43 = vpop.f32.mrf.mxu1 }
 0x2c1   : > { %v1631_v6 = vadd.f32 %v1630_v53, %v1542_v38  ;;  %1857 = vadd.xlane.f32.xlu1 %v1856_v62  ;;  %v1456_v49 = vadd.f32 %v1455_v43, %v1367_v40 }
 0x2c3   : > { %v1697_v12 = vmax.f32 %v1631_v6, 0.0  ;;  %v1698_v59 = vmax.f32 %v1456_v49, 0.0 }
 0x2c4   : > { %v1816_v27 = vpop.xlane.xlu2 %1815 }
 0x2c5   : > { %v1767_v48 = vmul.f32 %v2947_v17, %v1697_v12  ;;  %v1884_v51 = vadd.f32 %v3039_v36, %v1816_v27  ;;  %v1768_v1 = vmul.f32 %v2944_v31, %v1698_v59 }
 0x2c6   : > { %v1544_v52 = vpop.f32.mrf.mxu2  ;;  %v1368_v57 = vpop.f32.mrf.mxu0 }
 0x2c7   : > { %1917 = vst.msk [vmem:[%s3044_s9 + $0x70] sm:$0xff] %vm1902_vm0, %v1884_v51  ;;  %v1545_v9 = vadd.f32 %v1544_v52, %v2935_v19  ;;  %v1633_v22 = vpop.f32.mrf.mxu3  ;;  %v1859_v58 = vadd.f32 %v1767_v48, %v1766_v47  ;;  %v1369_v21 = vadd.f32 %v1368_v57, %v2926_v50  ;;  %v1457_v60 = vpop.f32.mrf.mxu1 }
 0x2c9   : > { %v1634_v0 = vadd.f32 %v1633_v22, %v1545_v9  ;;  %1860 = vadd.xlane.f32.xlu2 %v1859_v58  ;;  %v1458_v3 = vadd.f32 %v1457_v60, %v1369_v21 }
 0x2cb   : > { %v1699_v61 = vmax.f32 %v1634_v0, 0.0  ;;  %v1700_v41 = vmax.f32 %v1458_v3, 0.0 }
 0x2cc   : > { %v1819_v8 = vpop.xlane.xlu0 %1818 }
 0x2cd   : > { %v1769_v2 = vmul.f32 %v2947_v17, %v1699_v61  ;;  %v1885_v4 = vadd.f32 %v3039_v36, %v1819_v8  ;;  %v1770_v7 = vmul.f32 %v2944_v31, %v1700_v41 }
 0x2ce   : > { %v1546_v16 = vpop.f32.mrf.mxu2 }
 0x2cf   : > { %1918 = vst.msk [vmem:[%s3044_s9 + $0x78] sm:$0xff] %vm1902_vm0, %v1885_v4  ;;  %v1547_v29 = vadd.f32 %v1546_v16, %v2935_v19  ;;  %v1862_v34 = vadd.f32 %v1769_v2, %v1768_v1  ;;  %v1635_v50 = vpop.f32.mrf.mxu3 }
 0x2d1   : > { %v1636_v26 = vadd.f32 %v1635_v50, %v1547_v29  ;;  %1863 = vadd.xlane.f32.xlu0 %v1862_v34 }
 0x2d3   : > { %v1701_v46 = vmax.f32 %v1636_v26, 0.0 }
 0x2d4   : > { %v1822_v54 = vpop.xlane.xlu1 %1821 }
 0x2d5   : > { %v1771_v10 = vmul.f32 %v2947_v17, %v1701_v46  ;;  %v1886_v11 = vadd.f32 %v3039_v36, %v1822_v54 }
 0x2d7   : > { %1919 = vst.msk [vmem:[%s3044_s9 + $0x80] sm:$0xff] %vm1902_vm0, %v1886_v11  ;;  %v1865_v19 = vadd.f32 %v1771_v10, %v1770_v7 }
 0x2d9   : > { %1866 = vadd.xlane.f32.xlu1 %v1865_v19 }
 0x2dc   : > { %v1825_v13 = vpop.xlane.xlu2 %1824 }
 0x2dd   : > { %v1887_v15 = vadd.f32 %v3039_v36, %v1825_v13 }
 0x2df   : > { %1920 = vst.msk [vmem:[%s3044_s9 + $0x88] sm:$0xff] %vm1902_vm0, %v1887_v15 }
 0x2e4   : > { %v1828_v14 = vpop.xlane.xlu0 %1827 }
 0x2e5   : > { %v1888_v42 = vadd.f32 %v3039_v36, %v1828_v14 }
 0x2e7   : > { %1921 = vst.msk [vmem:[%s3044_s9 + $0x90] sm:$0xff] %vm1902_vm0, %v1888_v42 }
 0x2ec   : > { %v1831_v31 = vpop.xlane.xlu1 %1830 }
 0x2ed   : > { %v1889_v17 = vadd.f32 %v3039_v36, %v1831_v31 }
 0x2ef   : > { %1922 = vst.msk [vmem:[%s3044_s9 + $0x98] sm:$0xff] %vm1902_vm0, %v1889_v17 }
 0x2f4   : > { %v1834_v55 = vpop.xlane.xlu2 %1833 }
 0x2f5   : > { %v1890_v20 = vadd.f32 %v3039_v36, %v1834_v55 }
 0x2f7   : > { %1923 = vst.msk [vmem:[%s3044_s9 + $0xa0] sm:$0xff] %vm1902_vm0, %v1890_v20 }
 0x2fc   : > { %v1837_v24 = vpop.xlane.xlu0 %1836 }
 0x2fd   : > { %v1891_v23 = vadd.f32 %v3039_v36, %v1837_v24 }
 0x2ff   : > { %1924 = vst.msk [vmem:[%s3044_s9 + $0xa8] sm:$0xff] %vm1902_vm0, %v1891_v23 }
 0x304   : > { %v1840_v25 = vpop.xlane.xlu1 %1839 }
 0x305   : > { %v1892_v28 = vadd.f32 %v3039_v36, %v1840_v25 }
 0x307   : > { %1925 = vst.msk [vmem:[%s3044_s9 + $0xb0] sm:$0xff] %vm1902_vm0, %v1892_v28 }
 0x30c   : > { %v1843_v45 = vpop.xlane.xlu2 %1842 }
 0x30d   : > { %v1893_v30 = vadd.f32 %v3039_v36, %v1843_v45 }
 0x30f   : > { %1926 = vst.msk [vmem:[%s3044_s9 + $0xb8] sm:$0xff] %vm1902_vm0, %v1893_v30 }
 0x314   : > { %v1846_v5 = vpop.xlane.xlu0 %1845 }
 0x315   : > { %v1894_v32 = vadd.f32 %v3039_v36, %v1846_v5 }
 0x317   : > { %1927 = vst.msk [vmem:[%s3044_s9 + $0xc0] sm:$0xff] %vm1902_vm0, %v1894_v32 }
 0x31c   : > { %v1849_v33 = vpop.xlane.xlu1 %1848 }
 0x31d   : > { %v1895_v44 = vadd.f32 %v3039_v36, %v1849_v33 }
 0x31f   : > { %1928 = vst.msk [vmem:[%s3044_s9 + $0xc8] sm:$0xff] %vm1902_vm0, %v1895_v44 }
 0x324   : > { %v1852_v56 = vpop.xlane.xlu2 %1851 }
 0x325   : > { %v1896_v18 = vadd.f32 %v3039_v36, %v1852_v56 }
 0x327   : > { %1929 = vst.msk [vmem:[%s3044_s9 + $0xd0] sm:$0xff] %vm1902_vm0, %v1896_v18 }
 0x32c   : > { %v1855_v35 = vpop.xlane.xlu0 %1854 }
 0x32d   : > { %v1897_v37 = vadd.f32 %v3039_v36, %v1855_v35 }
 0x32f   : > { %1930 = vst.msk [vmem:[%s3044_s9 + $0xd8] sm:$0xff] %vm1902_vm0, %v1897_v37 }
 0x334   : > { %v1858_v38 = vpop.xlane.xlu1 %1857 }
 0x335   : > { %v1898_v53 = vadd.f32 %v3039_v36, %v1858_v38 }
 0x337   : > { %1931 = vst.msk [vmem:[%s3044_s9 + $0xe0] sm:$0xff] %vm1902_vm0, %v1898_v53 }
 0x33c   : > { %v1861_v63 = vpop.xlane.xlu2 %1860 }
 0x33d   : > { %v1899_v62 = vadd.f32 %v3039_v36, %v1861_v63 }
 0x33f   : > { %1932 = vst.msk [vmem:[%s3044_s9 + $0xe8] sm:$0xff] %vm1902_vm0, %v1899_v62 }
 0x344   : > { %v1864_v39 = vpop.xlane.xlu0 %1863 }
 0x345   : > { %v1900_v6 = vadd.f32 %v3039_v36, %v1864_v39 }
 0x347   : > { %1933 = vst.msk [vmem:[%s3044_s9 + $0xf0] sm:$0xff] %vm1902_vm0, %v1900_v6 }
 0x34c   : > { %v1867_v40 = vpop.xlane.xlu1 %1866 }
 0x34d   : > { %v1901_v43 = vadd.f32 %v3039_v36, %v1867_v40 }
 0x34f   : > { %1934 = vst.msk [vmem:[%s3044_s9 + $0xf8] sm:$0xff] %vm1902_vm0, %v1901_v43 }
 0x350 PF: > { %s3232_s10 = smov %s2664_s26  ;;  %p19_p4 = scmp.ge.s32.totalorder %s2653_s22, 4  }
 0x351   : > { %s3233_s26 = smov %s2545_s27  ;;  %s3234_s27 = smov %s2549_s28 }
 0x352   : > { %s3235_s28 = smov %s3232_s10  ;;  %s3236_s29 = smov %s2653_s22 }
 0x353   :  { %21 = sbr.rel (!%p19_p4) target bundleno = 6 (0x6), region = 96 }
 0x358   :  { %1957 = vsyncpa [#allocation4], 1 }
 0x359   :  { %1959 = vsyncpa [#allocation4 + $0x1], 1 }
 0x35a   :  { %1960 = vsyncpa [#allocation6], 1 }

</bundles_post_ra>
